<compile_context>
chip_gen: v6e
topology: v6e:2x2x1
jax: 0.10.0
libtpu: 0.0.40
codegen_flags: <defaults>
</compile_context>

<pallas_src>
import functools

import jax
import jax.numpy as jnp
from jax.experimental import pallas as pl
from jax.experimental.pallas import tpu as pltpu


OUT_LANES = 128          # lane-dense fused output width (logits + encoder state)
QKV_LANES = 128          # lane-dense fused QKV projection width (>= 3*H)


# ----------------------------- fused encoder kernel -------------------------

def _fused_encoder_kernel(
    x_ref, bias_ref, emb_g_ref, emb_b_ref,
    wqkv_ref, bqkv_ref, wo_ref, bo_ref, ln1_g_ref, ln1_b_ref,
    w1_ref, b1_ref, w2_ref, b2_ref, ln2_g_ref, ln2_b_ref,
    head_w_ref, head_b_ref,
    out_ref,
    *, batch, seq, hidden, num_heads, num_layers, head_dim, eps):
    M = batch * seq

    def layer_norm(v, g, b):
        mean = jnp.mean(v, axis=-1, keepdims=True)
        var = jnp.mean(jnp.square(v - mean), axis=-1, keepdims=True)
        return (v - mean) * jax.lax.rsqrt(var + eps) * g + b

    # Embedding LayerNorm; x stays (M, H) resident in VMEM for the whole kernel.
    x = layer_norm(x_ref[...], emb_g_ref[...], emb_b_ref[...])

    # Additive key-mask, broadcast ONCE to (batch, seq, seq) before the layer loop.
    bias = jnp.broadcast_to(bias_ref[...], (batch, seq, seq))

    for l in range(num_layers):                       # static unroll, L is small
        # ---- self-attention: one fused lane-dense QKV matmul ----
        qkv = jnp.dot(x, wqkv_ref[l],
                      preferred_element_type=jnp.float32) + bqkv_ref[l]   # (M, 128)
        ctx_heads = []
        for h in range(num_heads):                    # static unroll, nH is small
            q0 = h * head_dim
            qh = qkv[:, q0:q0 + head_dim].reshape(batch, seq, head_dim)
            kh = qkv[:, hidden + q0:hidden + q0 + head_dim].reshape(batch, seq, head_dim)
            vh = qkv[:, 2 * hidden + q0:2 * hidden + q0 + head_dim].reshape(batch, seq, head_dim)

            # (scale already folded into wq/bq host-side)
            s = jnp.einsum('bqd,bkd->bqk', qh, kh,
                           preferred_element_type=jnp.float32) + bias
            m = jnp.max(s, axis=-1, keepdims=True)
            p = jnp.exp(s - m)
            p = p * pl.reciprocal(jnp.sum(p, axis=-1, keepdims=True), approx=True)
            ctx_heads.append(jnp.einsum('bqk,bkd->bqd', p, vh,
                                        preferred_element_type=jnp.float32))
        # Merge heads via lane concat, then ONE output projection.
        ctx = jnp.concatenate(ctx_heads, axis=-1).reshape(M, hidden)
        attn = jnp.dot(ctx, wo_ref[l],
                       preferred_element_type=jnp.float32) + bo_ref[l]
        x = layer_norm(x + attn, ln1_g_ref[l], ln1_b_ref[l])

        # ---- feed-forward (tanh-GELU -> EUP) ----
        ff = jnp.dot(x, w1_ref[l], preferred_element_type=jnp.float32) + b1_ref[l]
        ff = jax.nn.gelu(ff, approximate=True)
        ff = jnp.dot(ff, w2_ref[l], preferred_element_type=jnp.float32) + b2_ref[l]
        x = layer_norm(x + ff, ln2_g_ref[l], ln2_b_ref[l])

    # Fused lane-dense output slab: [both-head logits (zero padded) | encoder state].
    logits = jnp.dot(x, head_w_ref[...],
                     preferred_element_type=jnp.float32) + head_b_ref[...]   # (M, 96)
    out_ref[...] = jnp.concatenate([logits, x], axis=-1).astype(out_ref.dtype)


def fused_encoder_call(packed, x_flat, mask_bias, batch, seq):
    """x_flat: (B*S, H) f32, mask_bias: (B, 1, S) f32.

    Returns the fused (B*S, 128) output slab:
      lanes [0 : n1+n2)        -> head1/head2 logits
      lanes [enc_off : +H)     -> encoder last_hidden_state
    """
    M, H = x_flat.shape

    kernel = functools.partial(
        _fused_encoder_kernel,
        batch=batch, seq=seq, hidden=H,
        num_heads=packed["num_heads"], num_layers=packed["num_layers"],
        head_dim=packed["head_dim"], eps=1e-12)

    def full(shape):
        zeros = (0,) * len(shape)
        return pl.BlockSpec(shape, lambda i: zeros)

    args = (x_flat, mask_bias,
            packed["emb_g"], packed["emb_b"],
            packed["wqkv"], packed["bqkv"], packed["wo"], packed["bo"],
            packed["ln1_g"], packed["ln1_b"],
            packed["w1"], packed["b1"], packed["w2"], packed["b2"],
            packed["ln2_g"], packed["ln2_b"],
            packed["head_w"], packed["head_b"])

    return pl.pallas_call(
        kernel,
        out_shape=jax.ShapeDtypeStruct((M, OUT_LANES), jnp.float32),
        grid=(1,),                                    # single invocation, whole batch
        in_specs=[full(a.shape) for a in args],
        out_specs=full((M, OUT_LANES)),
        compiler_params=pltpu.CompilerParams(
            dimension_semantics=("arbitrary",)),
    )(*args)


# ------------------------- synthetic encoder + heads ------------------------

def init_params(key, *, vocab=100, max_pos=32, hidden=32, num_heads=2, ffn=64,
                num_layers=2, num_labels1=3, num_labels2=5):
    keys = iter(jax.random.split(key, 128))

    def dense(shape):
        return jax.random.normal(next(keys), shape, jnp.float32) * 0.02

    params = {
        "num_heads": num_heads,
        "word_emb": dense((vocab, hidden)),
        "pos_emb": dense((max_pos, hidden)),
        "emb_ln_g": jnp.ones((hidden,), jnp.float32),
        "emb_ln_b": jnp.zeros((hidden,), jnp.float32),
        "layers": [],
        "head1_w": dense((hidden, num_labels1)),
        "head1_b": jnp.zeros((num_labels1,), jnp.float32),
        "head2_w": dense((hidden, num_labels2)),
        "head2_b": jnp.zeros((num_labels2,), jnp.float32),
    }
    for _ in range(num_layers):
        params["layers"].append({
            "wq": dense((hidden, hidden)), "bq": jnp.zeros((hidden,), jnp.float32),
            "wk": dense((hidden, hidden)), "bk": jnp.zeros((hidden,), jnp.float32),
            "wv": dense((hidden, hidden)), "bv": jnp.zeros((hidden,), jnp.float32),
            "wo": dense((hidden, hidden)), "bo": jnp.zeros((hidden,), jnp.float32),
            "ln1_g": jnp.ones((hidden,), jnp.float32),
            "ln1_b": jnp.zeros((hidden,), jnp.float32),
            "w1": dense((hidden, ffn)), "b1": jnp.zeros((ffn,), jnp.float32),
            "w2": dense((ffn, hidden)), "b2": jnp.zeros((hidden,), jnp.float32),
            "ln2_g": jnp.ones((hidden,), jnp.float32),
            "ln2_b": jnp.zeros((hidden,), jnp.float32),
        })
    return params


def pack_weights(params):
    """Host-side packing so the kernel needs only lane-dense matmuls:
      * Q/K/V fused per layer into one (H, 128) matrix, Q pre-scaled by 1/sqrt(Dh).
      * Both classification heads fused into one (H, 96) matrix (logits occupy the
        first 8 lanes of the fused 128-lane output; the encoder state rides in the
        last H lanes)."""
    H = params["word_emb"].shape[1]
    nH = params["num_heads"]
    Dh = H // nH
    scale = 1.0 / (Dh ** 0.5)
    layers = params["layers"]

    assert 3 * H <= QKV_LANES
    wqkv_l, bqkv_l = [], []
    for lp in layers:
        w = jnp.concatenate([lp["wq"] * scale, lp["wk"], lp["wv"]], axis=1)   # (H, 3H)
        b = jnp.concatenate([lp["bq"] * scale, lp["bk"], lp["bv"]])           # (3H,)
        wqkv_l.append(jnp.pad(w, ((0, 0), (0, QKV_LANES - 3 * H))))
        bqkv_l.append(jnp.pad(b, (0, QKV_LANES - 3 * H))[None, :])
    wqkv = jnp.stack(wqkv_l, axis=0)                                          # (L, H, 128)
    bqkv = jnp.stack(bqkv_l, axis=0)                                          # (L, 1, 128)

    wo = jnp.stack([lp["wo"] for lp in layers], axis=0)                       # (L, H, H)
    bo = jnp.stack([lp["bo"][None, :] for lp in layers], axis=0)              # (L, 1, H)
    ln1_g = jnp.stack([lp["ln1_g"][None, :] for lp in layers], axis=0)
    ln1_b = jnp.stack([lp["ln1_b"][None, :] for lp in layers], axis=0)
    w1 = jnp.stack([lp["w1"] for lp in layers], axis=0)                       # (L, H, F)
    b1 = jnp.stack([lp["b1"][None, :] for lp in layers], axis=0)              # (L, 1, F)
    w2 = jnp.stack([lp["w2"] for lp in layers], axis=0)                       # (L, F, H)
    b2 = jnp.stack([lp["b2"][None, :] for lp in layers], axis=0)              # (L, 1, H)
    ln2_g = jnp.stack([lp["ln2_g"][None, :] for lp in layers], axis=0)
    ln2_b = jnp.stack([lp["ln2_b"][None, :] for lp in layers], axis=0)

    n1 = params["head1_w"].shape[1]
    n2 = params["head2_w"].shape[1]
    p_head = OUT_LANES - H                   # 96 lanes reserved for logits (+zero pad)
    assert n1 + n2 <= p_head
    head_w = jnp.zeros((H, p_head), jnp.float32)
    head_w = head_w.at[:, :n1].set(params["head1_w"])
    head_w = head_w.at[:, n1:n1 + n2].set(params["head2_w"])
    head_b = jnp.zeros((1, p_head), jnp.float32)
    head_b = head_b.at[0, :n1].set(params["head1_b"])
    head_b = head_b.at[0, n1:n1 + n2].set(params["head2_b"])

    return dict(
        emb_g=params["emb_ln_g"][None, :], emb_b=params["emb_ln_b"][None, :],
        wqkv=wqkv, bqkv=bqkv, wo=wo, bo=bo,
        ln1_g=ln1_g, ln1_b=ln1_b, w1=w1, b1=b1, w2=w2, b2=b2,
        ln2_g=ln2_g, ln2_b=ln2_b,
        head_w=head_w, head_b=head_b,
        num_heads=nH, head_dim=Dh, num_layers=len(layers),
        num_labels1=n1, num_labels2=n2, enc_off=p_head, hidden=H,
    )


def _run_fused(params, packed, input_ids, attention_mask):
    B, S = input_ids.shape
    H = packed["hidden"]
    # Embedding gather + position add stay in JAX glue (single fused XLA op).
    x_emb = params["word_emb"][input_ids] + params["pos_emb"][None, :S, :]
    x_flat = x_emb.reshape(B * S, H)                       # (B*S, H), no in-kernel reshape
    # Additive key-mask bias computed ONCE per forward.
    mask_bias = ((1.0 - attention_mask.astype(jnp.float32)) * -1e9).reshape(B, 1, S)

    out = fused_encoder_call(packed, x_flat, mask_bias, B, S)     # (B*S, 128)
    out = out.reshape(B, S, OUT_LANES)
    enc = out[:, :, packed["enc_off"]:packed["enc_off"] + H]
    logits = out[:, :, :packed["num_labels1"] + packed["num_labels2"]]
    return enc, logits


def multi_task_forward(params, input1=None, input2=None):
    """Mirrors MultiTaskModel.forward: ((out1, out2), (enc1, enc2))."""
    packed = pack_weights(params)
    n1, n2 = packed["num_labels1"], packed["num_labels2"]

    output1 = output2 = None
    encoder_output1 = encoder_output2 = None

    if (input1 is not None and input2 is not None
            and input1["input_ids"].shape[1] == input2["input_ids"].shape[1]):
        # Batch both tasks through ONE fused encoder/head kernel call.
        B1 = input1["input_ids"].shape[0]
        ids = jnp.concatenate([input1["input_ids"], input2["input_ids"]], axis=0)
        msk = jnp.concatenate([input1["attention_mask"], input2["attention_mask"]], axis=0)
        enc, logits = _run_fused(params, packed, ids, msk)
        encoder_output1, encoder_output2 = enc[:B1], enc[B1:]
        output1 = logits[:B1, :, :n1]
        output2 = logits[B1:, :, n1:n1 + n2]
    else:
        if input1 is not None:
            encoder_output1, logits = _run_fused(
                params, packed, input1["input_ids"], input1["attention_mask"])
            output1 = logits[:, :, :n1]
        if input2 is not None:
            encoder_output2, logits = _run_fused(
                params, packed, input2["input_ids"], input2["attention_mask"])
            output2 = logits[:, :, n1:n1 + n2]

    return (output1, output2), (encoder_output1, encoder_output2)


# ----------------------------------- main -----------------------------------

if __name__ == "__main__":
    key = jax.random.PRNGKey(0)
    k_param, k_id1, k_id2 = jax.random.split(key, 3)

    B, S = 2, 8
    VOCAB = 100
    HIDDEN = 32
    params = init_params(k_param, vocab=VOCAB, hidden=HIDDEN, num_heads=2,
                         ffn=64, num_layers=2, num_labels1=3, num_labels2=5)

    input1 = {
        "input_ids": jax.random.randint(k_id1, (B, S), 0, VOCAB, dtype=jnp.int32),
        "attention_mask": jnp.ones((B, S), jnp.int32).at[:, -2:].set(0),  # pad last 2 tokens
    }
    input2 = {
        "input_ids": jax.random.randint(k_id2, (B, S), 0, VOCAB, dtype=jnp.int32),
        "attention_mask": jnp.ones((B, S), jnp.int32),
    }

    (out1, out2), (enc1, enc2) = multi_task_forward(params, input1=input1, input2=input2)
    jax.block_until_ready((out1, out2, enc1, enc2))

    assert out1.shape == (B, S, 3)
    assert out2.shape == (B, S, 5)
    assert enc1.shape == (B, S, HIDDEN)
    assert enc2.shape == (B, S, HIDDEN)
    assert bool(jnp.all(jnp.isfinite(out1))) and bool(jnp.all(jnp.isfinite(out2)))
    assert bool(jnp.all(jnp.isfinite(enc1))) and bool(jnp.all(jnp.isfinite(enc2)))

    print("KERNEL_OK")
</pallas_src>

<mosaic_0001>
module attributes {stable_mosaic.version = 11 : i64} {
  func.func @_fused_encoder_kernel(%arg0: i32, %arg1: memref<32x32xf32, #tpu.memory_space<vmem>>, %arg2: memref<4x1x8xf32, #tpu.memory_space<vmem>>, %arg3: memref<1x32xf32, #tpu.memory_space<vmem>>, %arg4: memref<1x32xf32, #tpu.memory_space<vmem>>, %arg5: memref<2x32x128xf32, #tpu.memory_space<vmem>>, %arg6: memref<2x1x128xf32, #tpu.memory_space<vmem>>, %arg7: memref<2x32x32xf32, #tpu.memory_space<vmem>>, %arg8: memref<2x1x32xf32, #tpu.memory_space<vmem>>, %arg9: memref<2x1x32xf32, #tpu.memory_space<vmem>>, %arg10: memref<2x1x32xf32, #tpu.memory_space<vmem>>, %arg11: memref<2x32x64xf32, #tpu.memory_space<vmem>>, %arg12: memref<2x1x64xf32, #tpu.memory_space<vmem>>, %arg13: memref<2x64x32xf32, #tpu.memory_space<vmem>>, %arg14: memref<2x1x32xf32, #tpu.memory_space<vmem>>, %arg15: memref<2x1x32xf32, #tpu.memory_space<vmem>>, %arg16: memref<2x1x32xf32, #tpu.memory_space<vmem>>, %arg17: memref<32x96xf32, #tpu.memory_space<vmem>>, %arg18: memref<1x96xf32, #tpu.memory_space<vmem>>, %arg19: memref<32x128xf32, #tpu.memory_space<vmem>>) attributes {dimension_semantics = [#tpu.dimension_semantics<arbitrary>], iteration_bounds = array<i64: 1>, scalar_prefetch = 0 : i64, scratch_operands = 0 : i64, tpu.core_type = #tpu.core_type<tc>, window_params = [{pipeline_mode = #tpu.pipeline_mode<synchronous>, transform_indices = @transform_0, window_bounds = array<i64: 32, 32>}, {pipeline_mode = #tpu.pipeline_mode<synchronous>, transform_indices = @transform_1, window_bounds = array<i64: 4, 1, 8>}, {pipeline_mode = #tpu.pipeline_mode<synchronous>, transform_indices = @transform_2, window_bounds = array<i64: 1, 32>}, {pipeline_mode = #tpu.pipeline_mode<synchronous>, transform_indices = @transform_3, window_bounds = array<i64: 1, 32>}, {pipeline_mode = #tpu.pipeline_mode<synchronous>, transform_indices = @transform_4, window_bounds = array<i64: 2, 32, 128>}, {pipeline_mode = #tpu.pipeline_mode<synchronous>, transform_indices = @transform_5, window_bounds = array<i64: 2, 1, 128>}, {pipeline_mode = #tpu.pipeline_mode<synchronous>, transform_indices = @transform_6, window_bounds = array<i64: 2, 32, 32>}, {pipeline_mode = #tpu.pipeline_mode<synchronous>, transform_indices = @transform_7, window_bounds = array<i64: 2, 1, 32>}, {pipeline_mode = #tpu.pipeline_mode<synchronous>, transform_indices = @transform_8, window_bounds = array<i64: 2, 1, 32>}, {pipeline_mode = #tpu.pipeline_mode<synchronous>, transform_indices = @transform_9, window_bounds = array<i64: 2, 1, 32>}, {pipeline_mode = #tpu.pipeline_mode<synchronous>, transform_indices = @transform_10, window_bounds = array<i64: 2, 32, 64>}, {pipeline_mode = #tpu.pipeline_mode<synchronous>, transform_indices = @transform_11, window_bounds = array<i64: 2, 1, 64>}, {pipeline_mode = #tpu.pipeline_mode<synchronous>, transform_indices = @transform_12, window_bounds = array<i64: 2, 64, 32>}, {pipeline_mode = #tpu.pipeline_mode<synchronous>, transform_indices = @transform_13, window_bounds = array<i64: 2, 1, 32>}, {pipeline_mode = #tpu.pipeline_mode<synchronous>, transform_indices = @transform_14, window_bounds = array<i64: 2, 1, 32>}, {pipeline_mode = #tpu.pipeline_mode<synchronous>, transform_indices = @transform_15, window_bounds = array<i64: 2, 1, 32>}, {pipeline_mode = #tpu.pipeline_mode<synchronous>, transform_indices = @transform_16, window_bounds = array<i64: 32, 96>}, {pipeline_mode = #tpu.pipeline_mode<synchronous>, transform_indices = @transform_17, window_bounds = array<i64: 1, 96>}, {pipeline_mode = #tpu.pipeline_mode<synchronous>, transform_indices = @transform_18, window_bounds = array<i64: 32, 128>}]} {
    %c0 = arith.constant 0 : index
    %c0_0 = arith.constant 0 : index
    %0 = vector.load %arg1[%c0, %c0_0] : memref<32x32xf32, #tpu.memory_space<vmem>>, vector<32x32xf32>
    %c0_1 = arith.constant 0 : index
    %c0_2 = arith.constant 0 : index
    %1 = vector.load %arg3[%c0_1, %c0_2] : memref<1x32xf32, #tpu.memory_space<vmem>>, vector<1x32xf32>
    %c0_3 = arith.constant 0 : index
    %c0_4 = arith.constant 0 : index
    %2 = vector.load %arg4[%c0_3, %c0_4] : memref<1x32xf32, #tpu.memory_space<vmem>>, vector<1x32xf32>
    %cst = arith.constant dense<0.000000e+00> : vector<32xf32>
    %3 = vector.multi_reduction <add>, %0, %cst [1] : vector<32x32xf32> to vector<32xf32>
    %4 = vector.shape_cast %3 : vector<32xf32> to vector<32x1xf32>
    %cst_5 = arith.constant 3.200000e+01 : f32
    %5 = vector.broadcast %cst_5 : f32 to vector<32x1xf32>
    %6 = arith.divf %4, %5 : vector<32x1xf32>
    %7 = vector.broadcast %6 : vector<32x1xf32> to vector<32x32xf32>
    %8 = arith.subf %0, %7 : vector<32x32xf32>
    %9 = arith.mulf %8, %8 : vector<32x32xf32>
    %cst_6 = arith.constant dense<0.000000e+00> : vector<32xf32>
    %10 = vector.multi_reduction <add>, %9, %cst_6 [1] : vector<32x32xf32> to vector<32xf32>
    %11 = vector.shape_cast %10 : vector<32xf32> to vector<32x1xf32>
    %cst_7 = arith.constant 3.200000e+01 : f32
    %12 = vector.broadcast %cst_7 : f32 to vector<32x1xf32>
    %13 = arith.divf %11, %12 : vector<32x1xf32>
    %14 = vector.broadcast %6 : vector<32x1xf32> to vector<32x32xf32>
    %15 = arith.subf %0, %14 : vector<32x32xf32>
    %cst_8 = arith.constant 9.99999996E-13 : f32
    %16 = vector.broadcast %cst_8 : f32 to vector<32x1xf32>
    %17 = arith.addf %13, %16 : vector<32x1xf32>
    %18 = math.rsqrt %17 : vector<32x1xf32>
    %19 = vector.broadcast %18 : vector<32x1xf32> to vector<32x32xf32>
    %20 = arith.mulf %15, %19 : vector<32x32xf32>
    %21 = vector.broadcast %1 : vector<1x32xf32> to vector<32x32xf32>
    %22 = arith.mulf %20, %21 : vector<32x32xf32>
    %23 = vector.broadcast %2 : vector<1x32xf32> to vector<32x32xf32>
    %24 = arith.addf %22, %23 : vector<32x32xf32>
    %c0_9 = arith.constant 0 : index
    %c0_10 = arith.constant 0 : index
    %c0_11 = arith.constant 0 : index
    %25 = vector.load %arg2[%c0_9, %c0_10, %c0_11] : memref<4x1x8xf32, #tpu.memory_space<vmem>>, vector<4x1x8xf32>
    %26 = vector.shape_cast %25 : vector<4x1x8xf32> to vector<4x1x8xf32>
    %27 = vector.broadcast %26 : vector<4x1x8xf32> to vector<4x8x8xf32>
    %c0_12 = arith.constant 0 : index
    %c0_13 = arith.constant 0 : index
    %c0_14 = arith.constant 0 : index
    %28 = vector.load %arg5[%c0_12, %c0_13, %c0_14] : memref<2x32x128xf32, #tpu.memory_space<vmem>>, vector<1x32x128xf32>
    %29 = vector.shape_cast %28 : vector<1x32x128xf32> to vector<32x128xf32>
    %cst_15 = arith.constant dense<0.000000e+00> : vector<32x128xf32>
    %30 = tpu.matmul %24, %29, %cst_15 {dimension_numbers = #tpu.dot_dimension_numbers<[1], [0], [0], [1], [0, 0, 1, 1], [], []>} : vector<32x32xf32>, vector<32x128xf32>, vector<32x128xf32> -> vector<32x128xf32>
    %c0_16 = arith.constant 0 : index
    %c0_17 = arith.constant 0 : index
    %c0_18 = arith.constant 0 : index
    %31 = vector.load %arg6[%c0_16, %c0_17, %c0_18] : memref<2x1x128xf32, #tpu.memory_space<vmem>>, vector<1x1x128xf32>
    %32 = vector.shape_cast %31 : vector<1x1x128xf32> to vector<1x128xf32>
    %33 = vector.broadcast %32 : vector<1x128xf32> to vector<32x128xf32>
    %34 = arith.addf %30, %33 : vector<32x128xf32>
    %35 = vector.extract_strided_slice %34 {offsets = [0, 0], sizes = [32, 16], strides = [1, 1]} : vector<32x128xf32> to vector<32x16xf32>
    %36 = vector.shape_cast %35 : vector<32x16xf32> to vector<4x8x16xf32>
    %37 = vector.extract_strided_slice %34 {offsets = [0, 32], sizes = [32, 16], strides = [1, 1]} : vector<32x128xf32> to vector<32x16xf32>
    %38 = vector.shape_cast %37 : vector<32x16xf32> to vector<4x8x16xf32>
    %39 = vector.extract_strided_slice %34 {offsets = [0, 64], sizes = [32, 16], strides = [1, 1]} : vector<32x128xf32> to vector<32x16xf32>
    %40 = vector.shape_cast %39 : vector<32x16xf32> to vector<4x8x16xf32>
    "tpu.trace_start"() <{level = 10 : i32, message = "bqd,bkd->bqk"}> : () -> ()
    %cst_19 = arith.constant dense<0.000000e+00> : vector<4x8x8xf32>
    %41 = tpu.matmul %36, %38, %cst_19 {dimension_numbers = #tpu.dot_dimension_numbers<[2], [2], [1], [1], [0, 0, 0, 1, 1, 1], [0], [0]>} : vector<4x8x16xf32>, vector<4x8x16xf32>, vector<4x8x8xf32> -> vector<4x8x8xf32>
    "tpu.trace_stop"() : () -> ()
    %42 = arith.addf %41, %27 : vector<4x8x8xf32>
    %cst_20 = arith.constant dense<0xFF800000> : vector<4x8xf32>
    %43 = vector.multi_reduction <maximumf>, %42, %cst_20 [2] : vector<4x8x8xf32> to vector<4x8xf32>
    %44 = vector.shape_cast %43 : vector<4x8xf32> to vector<4x8x1xf32>
    %45 = vector.broadcast %44 : vector<4x8x1xf32> to vector<4x8x8xf32>
    %46 = arith.subf %42, %45 : vector<4x8x8xf32>
    %47 = math.exp %46 : vector<4x8x8xf32>
    %cst_21 = arith.constant dense<0.000000e+00> : vector<4x8xf32>
    %48 = vector.multi_reduction <add>, %47, %cst_21 [2] : vector<4x8x8xf32> to vector<4x8xf32>
    %49 = vector.shape_cast %48 : vector<4x8xf32> to vector<4x8x1xf32>
    %50 = tpu.reciprocal %49 {approx = true} : vector<4x8x1xf32> -> vector<4x8x1xf32>
    %51 = vector.broadcast %50 : vector<4x8x1xf32> to vector<4x8x8xf32>
    %52 = arith.mulf %47, %51 : vector<4x8x8xf32>
    "tpu.trace_start"() <{level = 10 : i32, message = "bqk,bkd->bqd"}> : () -> ()
    %cst_22 = arith.constant dense<0.000000e+00> : vector<4x8x16xf32>
    %53 = tpu.matmul %52, %40, %cst_22 {dimension_numbers = #tpu.dot_dimension_numbers<[2], [1], [1], [2], [0, 0, 0, 1, 1, 2], [0], [0]>} : vector<4x8x8xf32>, vector<4x8x16xf32>, vector<4x8x16xf32> -> vector<4x8x16xf32>
    "tpu.trace_stop"() : () -> ()
    %54 = vector.extract_strided_slice %34 {offsets = [0, 16], sizes = [32, 16], strides = [1, 1]} : vector<32x128xf32> to vector<32x16xf32>
    %55 = vector.shape_cast %54 : vector<32x16xf32> to vector<4x8x16xf32>
    %56 = vector.extract_strided_slice %34 {offsets = [0, 48], sizes = [32, 16], strides = [1, 1]} : vector<32x128xf32> to vector<32x16xf32>
    %57 = vector.shape_cast %56 : vector<32x16xf32> to vector<4x8x16xf32>
    %58 = vector.extract_strided_slice %34 {offsets = [0, 80], sizes = [32, 16], strides = [1, 1]} : vector<32x128xf32> to vector<32x16xf32>
    %59 = vector.shape_cast %58 : vector<32x16xf32> to vector<4x8x16xf32>
    "tpu.trace_start"() <{level = 10 : i32, message = "bqd,bkd->bqk"}> : () -> ()
    %cst_23 = arith.constant dense<0.000000e+00> : vector<4x8x8xf32>
    %60 = tpu.matmul %55, %57, %cst_23 {dimension_numbers = #tpu.dot_dimension_numbers<[2], [2], [1], [1], [0, 0, 0, 1, 1, 1], [0], [0]>} : vector<4x8x16xf32>, vector<4x8x16xf32>, vector<4x8x8xf32> -> vector<4x8x8xf32>
    "tpu.trace_stop"() : () -> ()
    %61 = arith.addf %60, %27 : vector<4x8x8xf32>
    %cst_24 = arith.constant dense<0xFF800000> : vector<4x8xf32>
    %62 = vector.multi_reduction <maximumf>, %61, %cst_24 [2] : vector<4x8x8xf32> to vector<4x8xf32>
    %63 = vector.shape_cast %62 : vector<4x8xf32> to vector<4x8x1xf32>
    %64 = vector.broadcast %63 : vector<4x8x1xf32> to vector<4x8x8xf32>
    %65 = arith.subf %61, %64 : vector<4x8x8xf32>
    %66 = math.exp %65 : vector<4x8x8xf32>
    %cst_25 = arith.constant dense<0.000000e+00> : vector<4x8xf32>
    %67 = vector.multi_reduction <add>, %66, %cst_25 [2] : vector<4x8x8xf32> to vector<4x8xf32>
    %68 = vector.shape_cast %67 : vector<4x8xf32> to vector<4x8x1xf32>
    %69 = tpu.reciprocal %68 {approx = true} : vector<4x8x1xf32> -> vector<4x8x1xf32>
    %70 = vector.broadcast %69 : vector<4x8x1xf32> to vector<4x8x8xf32>
    %71 = arith.mulf %66, %70 : vector<4x8x8xf32>
    "tpu.trace_start"() <{level = 10 : i32, message = "bqk,bkd->bqd"}> : () -> ()
    %cst_26 = arith.constant dense<0.000000e+00> : vector<4x8x16xf32>
    %72 = tpu.matmul %71, %59, %cst_26 {dimension_numbers = #tpu.dot_dimension_numbers<[2], [1], [1], [2], [0, 0, 0, 1, 1, 2], [0], [0]>} : vector<4x8x8xf32>, vector<4x8x16xf32>, vector<4x8x16xf32> -> vector<4x8x16xf32>
    "tpu.trace_stop"() : () -> ()
    %73 = tpu.concatenate %53, %72 in 2 : vector<4x8x16xf32>, vector<4x8x16xf32> -> vector<4x8x32xf32>
    %74 = vector.shape_cast %73 : vector<4x8x32xf32> to vector<32x32xf32>
    %c0_27 = arith.constant 0 : index
    %c0_28 = arith.constant 0 : index
    %c0_29 = arith.constant 0 : index
    %75 = vector.load %arg7[%c0_27, %c0_28, %c0_29] : memref<2x32x32xf32, #tpu.memory_space<vmem>>, vector<1x32x32xf32>
    %76 = vector.shape_cast %75 : vector<1x32x32xf32> to vector<32x32xf32>
    %cst_30 = arith.constant dense<0.000000e+00> : vector<32x32xf32>
    %77 = tpu.matmul %74, %76, %cst_30 {dimension_numbers = #tpu.dot_dimension_numbers<[1], [0], [0], [1], [0, 0, 1, 1], [], []>} : vector<32x32xf32>, vector<32x32xf32>, vector<32x32xf32> -> vector<32x32xf32>
    %c0_31 = arith.constant 0 : index
    %c0_32 = arith.constant 0 : index
    %c0_33 = arith.constant 0 : index
    %78 = vector.load %arg8[%c0_31, %c0_32, %c0_33] : memref<2x1x32xf32, #tpu.memory_space<vmem>>, vector<1x1x32xf32>
    %79 = vector.shape_cast %78 : vector<1x1x32xf32> to vector<1x32xf32>
    %80 = vector.broadcast %79 : vector<1x32xf32> to vector<32x32xf32>
    %81 = arith.addf %77, %80 : vector<32x32xf32>
    %82 = arith.addf %24, %81 : vector<32x32xf32>
    %c0_34 = arith.constant 0 : index
    %c0_35 = arith.constant 0 : index
    %c0_36 = arith.constant 0 : index
    %83 = vector.load %arg9[%c0_34, %c0_35, %c0_36] : memref<2x1x32xf32, #tpu.memory_space<vmem>>, vector<1x1x32xf32>
    %84 = vector.shape_cast %83 : vector<1x1x32xf32> to vector<1x32xf32>
    %c0_37 = arith.constant 0 : index
    %c0_38 = arith.constant 0 : index
    %c0_39 = arith.constant 0 : index
    %85 = vector.load %arg10[%c0_37, %c0_38, %c0_39] : memref<2x1x32xf32, #tpu.memory_space<vmem>>, vector<1x1x32xf32>
    %86 = vector.shape_cast %85 : vector<1x1x32xf32> to vector<1x32xf32>
    %cst_40 = arith.constant dense<0.000000e+00> : vector<32xf32>
    %87 = vector.multi_reduction <add>, %82, %cst_40 [1] : vector<32x32xf32> to vector<32xf32>
    %88 = vector.shape_cast %87 : vector<32xf32> to vector<32x1xf32>
    %cst_41 = arith.constant 3.200000e+01 : f32
    %89 = vector.broadcast %cst_41 : f32 to vector<32x1xf32>
    %90 = arith.divf %88, %89 : vector<32x1xf32>
    %91 = vector.broadcast %90 : vector<32x1xf32> to vector<32x32xf32>
    %92 = arith.subf %82, %91 : vector<32x32xf32>
    %93 = arith.mulf %92, %92 : vector<32x32xf32>
    %cst_42 = arith.constant dense<0.000000e+00> : vector<32xf32>
    %94 = vector.multi_reduction <add>, %93, %cst_42 [1] : vector<32x32xf32> to vector<32xf32>
    %95 = vector.shape_cast %94 : vector<32xf32> to vector<32x1xf32>
    %cst_43 = arith.constant 3.200000e+01 : f32
    %96 = vector.broadcast %cst_43 : f32 to vector<32x1xf32>
    %97 = arith.divf %95, %96 : vector<32x1xf32>
    %98 = vector.broadcast %90 : vector<32x1xf32> to vector<32x32xf32>
    %99 = arith.subf %82, %98 : vector<32x32xf32>
    %cst_44 = arith.constant 9.99999996E-13 : f32
    %100 = vector.broadcast %cst_44 : f32 to vector<32x1xf32>
    %101 = arith.addf %97, %100 : vector<32x1xf32>
    %102 = math.rsqrt %101 : vector<32x1xf32>
    %103 = vector.broadcast %102 : vector<32x1xf32> to vector<32x32xf32>
    %104 = arith.mulf %99, %103 : vector<32x32xf32>
    %105 = vector.broadcast %84 : vector<1x32xf32> to vector<32x32xf32>
    %106 = arith.mulf %104, %105 : vector<32x32xf32>
    %107 = vector.broadcast %86 : vector<1x32xf32> to vector<32x32xf32>
    %108 = arith.addf %106, %107 : vector<32x32xf32>
    %c0_45 = arith.constant 0 : index
    %c0_46 = arith.constant 0 : index
    %c0_47 = arith.constant 0 : index
    %109 = vector.load %arg11[%c0_45, %c0_46, %c0_47] : memref<2x32x64xf32, #tpu.memory_space<vmem>>, vector<1x32x64xf32>
    %110 = vector.shape_cast %109 : vector<1x32x64xf32> to vector<32x64xf32>
    %cst_48 = arith.constant dense<0.000000e+00> : vector<32x64xf32>
    %111 = tpu.matmul %108, %110, %cst_48 {dimension_numbers = #tpu.dot_dimension_numbers<[1], [0], [0], [1], [0, 0, 1, 1], [], []>} : vector<32x32xf32>, vector<32x64xf32>, vector<32x64xf32> -> vector<32x64xf32>
    %c0_49 = arith.constant 0 : index
    %c0_50 = arith.constant 0 : index
    %c0_51 = arith.constant 0 : index
    %112 = vector.load %arg12[%c0_49, %c0_50, %c0_51] : memref<2x1x64xf32, #tpu.memory_space<vmem>>, vector<1x1x64xf32>
    %113 = vector.shape_cast %112 : vector<1x1x64xf32> to vector<1x64xf32>
    %114 = vector.broadcast %113 : vector<1x64xf32> to vector<32x64xf32>
    %115 = arith.addf %111, %114 : vector<32x64xf32>
    %116 = arith.mulf %115, %115 : vector<32x64xf32>
    %117 = arith.mulf %115, %116 : vector<32x64xf32>
    %cst_52 = arith.constant 4.471500e-02 : f32
    %118 = vector.broadcast %cst_52 : f32 to vector<32x64xf32>
    %119 = arith.mulf %118, %117 : vector<32x64xf32>
    %120 = arith.addf %115, %119 : vector<32x64xf32>
    %cst_53 = arith.constant 0.797884583 : f32
    %121 = vector.broadcast %cst_53 : f32 to vector<32x64xf32>
    %122 = arith.mulf %121, %120 : vector<32x64xf32>
    %123 = math.tanh %122 : vector<32x64xf32>
    %cst_54 = arith.constant 1.000000e+00 : f32
    %124 = vector.broadcast %cst_54 : f32 to vector<32x64xf32>
    %125 = arith.addf %124, %123 : vector<32x64xf32>
    %cst_55 = arith.constant 5.000000e-01 : f32
    %126 = vector.broadcast %cst_55 : f32 to vector<32x64xf32>
    %127 = arith.mulf %126, %125 : vector<32x64xf32>
    %128 = arith.mulf %115, %127 : vector<32x64xf32>
    %c0_56 = arith.constant 0 : index
    %c0_57 = arith.constant 0 : index
    %c0_58 = arith.constant 0 : index
    %129 = vector.load %arg13[%c0_56, %c0_57, %c0_58] : memref<2x64x32xf32, #tpu.memory_space<vmem>>, vector<1x64x32xf32>
    %130 = vector.shape_cast %129 : vector<1x64x32xf32> to vector<64x32xf32>
    %cst_59 = arith.constant dense<0.000000e+00> : vector<32x32xf32>
    %131 = tpu.matmul %128, %130, %cst_59 {dimension_numbers = #tpu.dot_dimension_numbers<[1], [0], [0], [1], [0, 0, 1, 1], [], []>} : vector<32x64xf32>, vector<64x32xf32>, vector<32x32xf32> -> vector<32x32xf32>
    %c0_60 = arith.constant 0 : index
    %c0_61 = arith.constant 0 : index
    %c0_62 = arith.constant 0 : index
    %132 = vector.load %arg14[%c0_60, %c0_61, %c0_62] : memref<2x1x32xf32, #tpu.memory_space<vmem>>, vector<1x1x32xf32>
    %133 = vector.shape_cast %132 : vector<1x1x32xf32> to vector<1x32xf32>
    %134 = vector.broadcast %133 : vector<1x32xf32> to vector<32x32xf32>
    %135 = arith.addf %131, %134 : vector<32x32xf32>
    %136 = arith.addf %108, %135 : vector<32x32xf32>
    %c0_63 = arith.constant 0 : index
    %c0_64 = arith.constant 0 : index
    %c0_65 = arith.constant 0 : index
    %137 = vector.load %arg15[%c0_63, %c0_64, %c0_65] : memref<2x1x32xf32, #tpu.memory_space<vmem>>, vector<1x1x32xf32>
    %138 = vector.shape_cast %137 : vector<1x1x32xf32> to vector<1x32xf32>
    %c0_66 = arith.constant 0 : index
    %c0_67 = arith.constant 0 : index
    %c0_68 = arith.constant 0 : index
    %139 = vector.load %arg16[%c0_66, %c0_67, %c0_68] : memref<2x1x32xf32, #tpu.memory_space<vmem>>, vector<1x1x32xf32>
    %140 = vector.shape_cast %139 : vector<1x1x32xf32> to vector<1x32xf32>
    %cst_69 = arith.constant dense<0.000000e+00> : vector<32xf32>
    %141 = vector.multi_reduction <add>, %136, %cst_69 [1] : vector<32x32xf32> to vector<32xf32>
    %142 = vector.shape_cast %141 : vector<32xf32> to vector<32x1xf32>
    %cst_70 = arith.constant 3.200000e+01 : f32
    %143 = vector.broadcast %cst_70 : f32 to vector<32x1xf32>
    %144 = arith.divf %142, %143 : vector<32x1xf32>
    %145 = vector.broadcast %144 : vector<32x1xf32> to vector<32x32xf32>
    %146 = arith.subf %136, %145 : vector<32x32xf32>
    %147 = arith.mulf %146, %146 : vector<32x32xf32>
    %cst_71 = arith.constant dense<0.000000e+00> : vector<32xf32>
    %148 = vector.multi_reduction <add>, %147, %cst_71 [1] : vector<32x32xf32> to vector<32xf32>
    %149 = vector.shape_cast %148 : vector<32xf32> to vector<32x1xf32>
    %cst_72 = arith.constant 3.200000e+01 : f32
    %150 = vector.broadcast %cst_72 : f32 to vector<32x1xf32>
    %151 = arith.divf %149, %150 : vector<32x1xf32>
    %152 = vector.broadcast %144 : vector<32x1xf32> to vector<32x32xf32>
    %153 = arith.subf %136, %152 : vector<32x32xf32>
    %cst_73 = arith.constant 9.99999996E-13 : f32
    %154 = vector.broadcast %cst_73 : f32 to vector<32x1xf32>
    %155 = arith.addf %151, %154 : vector<32x1xf32>
    %156 = math.rsqrt %155 : vector<32x1xf32>
    %157 = vector.broadcast %156 : vector<32x1xf32> to vector<32x32xf32>
    %158 = arith.mulf %153, %157 : vector<32x32xf32>
    %159 = vector.broadcast %138 : vector<1x32xf32> to vector<32x32xf32>
    %160 = arith.mulf %158, %159 : vector<32x32xf32>
    %161 = vector.broadcast %140 : vector<1x32xf32> to vector<32x32xf32>
    %162 = arith.addf %160, %161 : vector<32x32xf32>
    %c1 = arith.constant 1 : index
    %c0_74 = arith.constant 0 : index
    %c0_75 = arith.constant 0 : index
    %163 = vector.load %arg5[%c1, %c0_74, %c0_75] : memref<2x32x128xf32, #tpu.memory_space<vmem>>, vector<1x32x128xf32>
    %164 = vector.shape_cast %163 : vector<1x32x128xf32> to vector<32x128xf32>
    %cst_76 = arith.constant dense<0.000000e+00> : vector<32x128xf32>
    %165 = tpu.matmul %162, %164, %cst_76 {dimension_numbers = #tpu.dot_dimension_numbers<[1], [0], [0], [1], [0, 0, 1, 1], [], []>} : vector<32x32xf32>, vector<32x128xf32>, vector<32x128xf32> -> vector<32x128xf32>
    %c1_77 = arith.constant 1 : index
    %c0_78 = arith.constant 0 : index
    %c0_79 = arith.constant 0 : index
    %166 = vector.load %arg6[%c1_77, %c0_78, %c0_79] : memref<2x1x128xf32, #tpu.memory_space<vmem>>, vector<1x1x128xf32>
    %167 = vector.shape_cast %166 : vector<1x1x128xf32> to vector<1x128xf32>
    %168 = vector.broadcast %167 : vector<1x128xf32> to vector<32x128xf32>
    %169 = arith.addf %165, %168 : vector<32x128xf32>
    %170 = vector.extract_strided_slice %169 {offsets = [0, 0], sizes = [32, 16], strides = [1, 1]} : vector<32x128xf32> to vector<32x16xf32>
    %171 = vector.shape_cast %170 : vector<32x16xf32> to vector<4x8x16xf32>
    %172 = vector.extract_strided_slice %169 {offsets = [0, 32], sizes = [32, 16], strides = [1, 1]} : vector<32x128xf32> to vector<32x16xf32>
    %173 = vector.shape_cast %172 : vector<32x16xf32> to vector<4x8x16xf32>
    %174 = vector.extract_strided_slice %169 {offsets = [0, 64], sizes = [32, 16], strides = [1, 1]} : vector<32x128xf32> to vector<32x16xf32>
    %175 = vector.shape_cast %174 : vector<32x16xf32> to vector<4x8x16xf32>
    "tpu.trace_start"() <{level = 10 : i32, message = "bqd,bkd->bqk"}> : () -> ()
    %cst_80 = arith.constant dense<0.000000e+00> : vector<4x8x8xf32>
    %176 = tpu.matmul %171, %173, %cst_80 {dimension_numbers = #tpu.dot_dimension_numbers<[2], [2], [1], [1], [0, 0, 0, 1, 1, 1], [0], [0]>} : vector<4x8x16xf32>, vector<4x8x16xf32>, vector<4x8x8xf32> -> vector<4x8x8xf32>
    "tpu.trace_stop"() : () -> ()
    %177 = arith.addf %176, %27 : vector<4x8x8xf32>
    %cst_81 = arith.constant dense<0xFF800000> : vector<4x8xf32>
    %178 = vector.multi_reduction <maximumf>, %177, %cst_81 [2] : vector<4x8x8xf32> to vector<4x8xf32>
    %179 = vector.shape_cast %178 : vector<4x8xf32> to vector<4x8x1xf32>
    %180 = vector.broadcast %179 : vector<4x8x1xf32> to vector<4x8x8xf32>
    %181 = arith.subf %177, %180 : vector<4x8x8xf32>
    %182 = math.exp %181 : vector<4x8x8xf32>
    %cst_82 = arith.constant dense<0.000000e+00> : vector<4x8xf32>
    %183 = vector.multi_reduction <add>, %182, %cst_82 [2] : vector<4x8x8xf32> to vector<4x8xf32>
    %184 = vector.shape_cast %183 : vector<4x8xf32> to vector<4x8x1xf32>
    %185 = tpu.reciprocal %184 {approx = true} : vector<4x8x1xf32> -> vector<4x8x1xf32>
    %186 = vector.broadcast %185 : vector<4x8x1xf32> to vector<4x8x8xf32>
    %187 = arith.mulf %182, %186 : vector<4x8x8xf32>
    "tpu.trace_start"() <{level = 10 : i32, message = "bqk,bkd->bqd"}> : () -> ()
    %cst_83 = arith.constant dense<0.000000e+00> : vector<4x8x16xf32>
    %188 = tpu.matmul %187, %175, %cst_83 {dimension_numbers = #tpu.dot_dimension_numbers<[2], [1], [1], [2], [0, 0, 0, 1, 1, 2], [0], [0]>} : vector<4x8x8xf32>, vector<4x8x16xf32>, vector<4x8x16xf32> -> vector<4x8x16xf32>
    "tpu.trace_stop"() : () -> ()
    %189 = vector.extract_strided_slice %169 {offsets = [0, 16], sizes = [32, 16], strides = [1, 1]} : vector<32x128xf32> to vector<32x16xf32>
    %190 = vector.shape_cast %189 : vector<32x16xf32> to vector<4x8x16xf32>
    %191 = vector.extract_strided_slice %169 {offsets = [0, 48], sizes = [32, 16], strides = [1, 1]} : vector<32x128xf32> to vector<32x16xf32>
    %192 = vector.shape_cast %191 : vector<32x16xf32> to vector<4x8x16xf32>
    %193 = vector.extract_strided_slice %169 {offsets = [0, 80], sizes = [32, 16], strides = [1, 1]} : vector<32x128xf32> to vector<32x16xf32>
    %194 = vector.shape_cast %193 : vector<32x16xf32> to vector<4x8x16xf32>
    "tpu.trace_start"() <{level = 10 : i32, message = "bqd,bkd->bqk"}> : () -> ()
    %cst_84 = arith.constant dense<0.000000e+00> : vector<4x8x8xf32>
    %195 = tpu.matmul %190, %192, %cst_84 {dimension_numbers = #tpu.dot_dimension_numbers<[2], [2], [1], [1], [0, 0, 0, 1, 1, 1], [0], [0]>} : vector<4x8x16xf32>, vector<4x8x16xf32>, vector<4x8x8xf32> -> vector<4x8x8xf32>
    "tpu.trace_stop"() : () -> ()
    %196 = arith.addf %195, %27 : vector<4x8x8xf32>
    %cst_85 = arith.constant dense<0xFF800000> : vector<4x8xf32>
    %197 = vector.multi_reduction <maximumf>, %196, %cst_85 [2] : vector<4x8x8xf32> to vector<4x8xf32>
    %198 = vector.shape_cast %197 : vector<4x8xf32> to vector<4x8x1xf32>
    %199 = vector.broadcast %198 : vector<4x8x1xf32> to vector<4x8x8xf32>
    %200 = arith.subf %196, %199 : vector<4x8x8xf32>
    %201 = math.exp %200 : vector<4x8x8xf32>
    %cst_86 = arith.constant dense<0.000000e+00> : vector<4x8xf32>
    %202 = vector.multi_reduction <add>, %201, %cst_86 [2] : vector<4x8x8xf32> to vector<4x8xf32>
    %203 = vector.shape_cast %202 : vector<4x8xf32> to vector<4x8x1xf32>
    %204 = tpu.reciprocal %203 {approx = true} : vector<4x8x1xf32> -> vector<4x8x1xf32>
    %205 = vector.broadcast %204 : vector<4x8x1xf32> to vector<4x8x8xf32>
    %206 = arith.mulf %201, %205 : vector<4x8x8xf32>
    "tpu.trace_start"() <{level = 10 : i32, message = "bqk,bkd->bqd"}> : () -> ()
    %cst_87 = arith.constant dense<0.000000e+00> : vector<4x8x16xf32>
    %207 = tpu.matmul %206, %194, %cst_87 {dimension_numbers = #tpu.dot_dimension_numbers<[2], [1], [1], [2], [0, 0, 0, 1, 1, 2], [0], [0]>} : vector<4x8x8xf32>, vector<4x8x16xf32>, vector<4x8x16xf32> -> vector<4x8x16xf32>
    "tpu.trace_stop"() : () -> ()
    %208 = tpu.concatenate %188, %207 in 2 : vector<4x8x16xf32>, vector<4x8x16xf32> -> vector<4x8x32xf32>
    %209 = vector.shape_cast %208 : vector<4x8x32xf32> to vector<32x32xf32>
    %c1_88 = arith.constant 1 : index
    %c0_89 = arith.constant 0 : index
    %c0_90 = arith.constant 0 : index
    %210 = vector.load %arg7[%c1_88, %c0_89, %c0_90] : memref<2x32x32xf32, #tpu.memory_space<vmem>>, vector<1x32x32xf32>
    %211 = vector.shape_cast %210 : vector<1x32x32xf32> to vector<32x32xf32>
    %cst_91 = arith.constant dense<0.000000e+00> : vector<32x32xf32>
    %212 = tpu.matmul %209, %211, %cst_91 {dimension_numbers = #tpu.dot_dimension_numbers<[1], [0], [0], [1], [0, 0, 1, 1], [], []>} : vector<32x32xf32>, vector<32x32xf32>, vector<32x32xf32> -> vector<32x32xf32>
    %c1_92 = arith.constant 1 : index
    %c0_93 = arith.constant 0 : index
    %c0_94 = arith.constant 0 : index
    %213 = vector.load %arg8[%c1_92, %c0_93, %c0_94] : memref<2x1x32xf32, #tpu.memory_space<vmem>>, vector<1x1x32xf32>
    %214 = vector.shape_cast %213 : vector<1x1x32xf32> to vector<1x32xf32>
    %215 = vector.broadcast %214 : vector<1x32xf32> to vector<32x32xf32>
    %216 = arith.addf %212, %215 : vector<32x32xf32>
    %217 = arith.addf %162, %216 : vector<32x32xf32>
    %c1_95 = arith.constant 1 : index
    %c0_96 = arith.constant 0 : index
    %c0_97 = arith.constant 0 : index
    %218 = vector.load %arg9[%c1_95, %c0_96, %c0_97] : memref<2x1x32xf32, #tpu.memory_space<vmem>>, vector<1x1x32xf32>
    %219 = vector.shape_cast %218 : vector<1x1x32xf32> to vector<1x32xf32>
    %c1_98 = arith.constant 1 : index
    %c0_99 = arith.constant 0 : index
    %c0_100 = arith.constant 0 : index
    %220 = vector.load %arg10[%c1_98, %c0_99, %c0_100] : memref<2x1x32xf32, #tpu.memory_space<vmem>>, vector<1x1x32xf32>
    %221 = vector.shape_cast %220 : vector<1x1x32xf32> to vector<1x32xf32>
    %cst_101 = arith.constant dense<0.000000e+00> : vector<32xf32>
    %222 = vector.multi_reduction <add>, %217, %cst_101 [1] : vector<32x32xf32> to vector<32xf32>
    %223 = vector.shape_cast %222 : vector<32xf32> to vector<32x1xf32>
    %cst_102 = arith.constant 3.200000e+01 : f32
    %224 = vector.broadcast %cst_102 : f32 to vector<32x1xf32>
    %225 = arith.divf %223, %224 : vector<32x1xf32>
    %226 = vector.broadcast %225 : vector<32x1xf32> to vector<32x32xf32>
    %227 = arith.subf %217, %226 : vector<32x32xf32>
    %228 = arith.mulf %227, %227 : vector<32x32xf32>
    %cst_103 = arith.constant dense<0.000000e+00> : vector<32xf32>
    %229 = vector.multi_reduction <add>, %228, %cst_103 [1] : vector<32x32xf32> to vector<32xf32>
    %230 = vector.shape_cast %229 : vector<32xf32> to vector<32x1xf32>
    %cst_104 = arith.constant 3.200000e+01 : f32
    %231 = vector.broadcast %cst_104 : f32 to vector<32x1xf32>
    %232 = arith.divf %230, %231 : vector<32x1xf32>
    %233 = vector.broadcast %225 : vector<32x1xf32> to vector<32x32xf32>
    %234 = arith.subf %217, %233 : vector<32x32xf32>
    %cst_105 = arith.constant 9.99999996E-13 : f32
    %235 = vector.broadcast %cst_105 : f32 to vector<32x1xf32>
    %236 = arith.addf %232, %235 : vector<32x1xf32>
    %237 = math.rsqrt %236 : vector<32x1xf32>
    %238 = vector.broadcast %237 : vector<32x1xf32> to vector<32x32xf32>
    %239 = arith.mulf %234, %238 : vector<32x32xf32>
    %240 = vector.broadcast %219 : vector<1x32xf32> to vector<32x32xf32>
    %241 = arith.mulf %239, %240 : vector<32x32xf32>
    %242 = vector.broadcast %221 : vector<1x32xf32> to vector<32x32xf32>
    %243 = arith.addf %241, %242 : vector<32x32xf32>
    %c1_106 = arith.constant 1 : index
    %c0_107 = arith.constant 0 : index
    %c0_108 = arith.constant 0 : index
    %244 = vector.load %arg11[%c1_106, %c0_107, %c0_108] : memref<2x32x64xf32, #tpu.memory_space<vmem>>, vector<1x32x64xf32>
    %245 = vector.shape_cast %244 : vector<1x32x64xf32> to vector<32x64xf32>
    %cst_109 = arith.constant dense<0.000000e+00> : vector<32x64xf32>
    %246 = tpu.matmul %243, %245, %cst_109 {dimension_numbers = #tpu.dot_dimension_numbers<[1], [0], [0], [1], [0, 0, 1, 1], [], []>} : vector<32x32xf32>, vector<32x64xf32>, vector<32x64xf32> -> vector<32x64xf32>
    %c1_110 = arith.constant 1 : index
    %c0_111 = arith.constant 0 : index
    %c0_112 = arith.constant 0 : index
    %247 = vector.load %arg12[%c1_110, %c0_111, %c0_112] : memref<2x1x64xf32, #tpu.memory_space<vmem>>, vector<1x1x64xf32>
    %248 = vector.shape_cast %247 : vector<1x1x64xf32> to vector<1x64xf32>
    %249 = vector.broadcast %248 : vector<1x64xf32> to vector<32x64xf32>
    %250 = arith.addf %246, %249 : vector<32x64xf32>
    %251 = arith.mulf %250, %250 : vector<32x64xf32>
    %252 = arith.mulf %250, %251 : vector<32x64xf32>
    %cst_113 = arith.constant 4.471500e-02 : f32
    %253 = vector.broadcast %cst_113 : f32 to vector<32x64xf32>
    %254 = arith.mulf %253, %252 : vector<32x64xf32>
    %255 = arith.addf %250, %254 : vector<32x64xf32>
    %cst_114 = arith.constant 0.797884583 : f32
    %256 = vector.broadcast %cst_114 : f32 to vector<32x64xf32>
    %257 = arith.mulf %256, %255 : vector<32x64xf32>
    %258 = math.tanh %257 : vector<32x64xf32>
    %cst_115 = arith.constant 1.000000e+00 : f32
    %259 = vector.broadcast %cst_115 : f32 to vector<32x64xf32>
    %260 = arith.addf %259, %258 : vector<32x64xf32>
    %cst_116 = arith.constant 5.000000e-01 : f32
    %261 = vector.broadcast %cst_116 : f32 to vector<32x64xf32>
    %262 = arith.mulf %261, %260 : vector<32x64xf32>
    %263 = arith.mulf %250, %262 : vector<32x64xf32>
    %c1_117 = arith.constant 1 : index
    %c0_118 = arith.constant 0 : index
    %c0_119 = arith.constant 0 : index
    %264 = vector.load %arg13[%c1_117, %c0_118, %c0_119] : memref<2x64x32xf32, #tpu.memory_space<vmem>>, vector<1x64x32xf32>
    %265 = vector.shape_cast %264 : vector<1x64x32xf32> to vector<64x32xf32>
    %cst_120 = arith.constant dense<0.000000e+00> : vector<32x32xf32>
    %266 = tpu.matmul %263, %265, %cst_120 {dimension_numbers = #tpu.dot_dimension_numbers<[1], [0], [0], [1], [0, 0, 1, 1], [], []>} : vector<32x64xf32>, vector<64x32xf32>, vector<32x32xf32> -> vector<32x32xf32>
    %c1_121 = arith.constant 1 : index
    %c0_122 = arith.constant 0 : index
    %c0_123 = arith.constant 0 : index
    %267 = vector.load %arg14[%c1_121, %c0_122, %c0_123] : memref<2x1x32xf32, #tpu.memory_space<vmem>>, vector<1x1x32xf32>
    %268 = vector.shape_cast %267 : vector<1x1x32xf32> to vector<1x32xf32>
    %269 = vector.broadcast %268 : vector<1x32xf32> to vector<32x32xf32>
    %270 = arith.addf %266, %269 : vector<32x32xf32>
    %271 = arith.addf %243, %270 : vector<32x32xf32>
    %c1_124 = arith.constant 1 : index
    %c0_125 = arith.constant 0 : index
    %c0_126 = arith.constant 0 : index
    %272 = vector.load %arg15[%c1_124, %c0_125, %c0_126] : memref<2x1x32xf32, #tpu.memory_space<vmem>>, vector<1x1x32xf32>
    %273 = vector.shape_cast %272 : vector<1x1x32xf32> to vector<1x32xf32>
    %c1_127 = arith.constant 1 : index
    %c0_128 = arith.constant 0 : index
    %c0_129 = arith.constant 0 : index
    %274 = vector.load %arg16[%c1_127, %c0_128, %c0_129] : memref<2x1x32xf32, #tpu.memory_space<vmem>>, vector<1x1x32xf32>
    %275 = vector.shape_cast %274 : vector<1x1x32xf32> to vector<1x32xf32>
    %cst_130 = arith.constant dense<0.000000e+00> : vector<32xf32>
    %276 = vector.multi_reduction <add>, %271, %cst_130 [1] : vector<32x32xf32> to vector<32xf32>
    %277 = vector.shape_cast %276 : vector<32xf32> to vector<32x1xf32>
    %cst_131 = arith.constant 3.200000e+01 : f32
    %278 = vector.broadcast %cst_131 : f32 to vector<32x1xf32>
    %279 = arith.divf %277, %278 : vector<32x1xf32>
    %280 = vector.broadcast %279 : vector<32x1xf32> to vector<32x32xf32>
    %281 = arith.subf %271, %280 : vector<32x32xf32>
    %282 = arith.mulf %281, %281 : vector<32x32xf32>
    %cst_132 = arith.constant dense<0.000000e+00> : vector<32xf32>
    %283 = vector.multi_reduction <add>, %282, %cst_132 [1] : vector<32x32xf32> to vector<32xf32>
    %284 = vector.shape_cast %283 : vector<32xf32> to vector<32x1xf32>
    %cst_133 = arith.constant 3.200000e+01 : f32
    %285 = vector.broadcast %cst_133 : f32 to vector<32x1xf32>
    %286 = arith.divf %284, %285 : vector<32x1xf32>
    %287 = vector.broadcast %279 : vector<32x1xf32> to vector<32x32xf32>
    %288 = arith.subf %271, %287 : vector<32x32xf32>
    %cst_134 = arith.constant 9.99999996E-13 : f32
    %289 = vector.broadcast %cst_134 : f32 to vector<32x1xf32>
    %290 = arith.addf %286, %289 : vector<32x1xf32>
    %291 = math.rsqrt %290 : vector<32x1xf32>
    %292 = vector.broadcast %291 : vector<32x1xf32> to vector<32x32xf32>
    %293 = arith.mulf %288, %292 : vector<32x32xf32>
    %294 = vector.broadcast %273 : vector<1x32xf32> to vector<32x32xf32>
    %295 = arith.mulf %293, %294 : vector<32x32xf32>
    %296 = vector.broadcast %275 : vector<1x32xf32> to vector<32x32xf32>
    %297 = arith.addf %295, %296 : vector<32x32xf32>
    %c0_135 = arith.constant 0 : index
    %c0_136 = arith.constant 0 : index
    %298 = vector.load %arg17[%c0_135, %c0_136] : memref<32x96xf32, #tpu.memory_space<vmem>>, vector<32x96xf32>
    %cst_137 = arith.constant dense<0.000000e+00> : vector<32x96xf32>
    %299 = tpu.matmul %297, %298, %cst_137 {dimension_numbers = #tpu.dot_dimension_numbers<[1], [0], [0], [1], [0, 0, 1, 1], [], []>} : vector<32x32xf32>, vector<32x96xf32>, vector<32x96xf32> -> vector<32x96xf32>
    %c0_138 = arith.constant 0 : index
    %c0_139 = arith.constant 0 : index
    %300 = vector.load %arg18[%c0_138, %c0_139] : memref<1x96xf32, #tpu.memory_space<vmem>>, vector<1x96xf32>
    %301 = vector.broadcast %300 : vector<1x96xf32> to vector<32x96xf32>
    %302 = arith.addf %299, %301 : vector<32x96xf32>
    %303 = tpu.concatenate %302, %297 in 1 : vector<32x96xf32>, vector<32x32xf32> -> vector<32x128xf32>
    %c0_140 = arith.constant 0 : index
    %c0_141 = arith.constant 0 : index
    %304 = vector.load %arg19[%c0_140, %c0_141] : memref<32x128xf32, #tpu.memory_space<vmem>>, vector<32x128xf32>
    tpu.vector_store %arg19[%c0_140, %c0_141], %303 {strides = array<i32>} : memref<32x128xf32, #tpu.memory_space<vmem>>, vector<32x128xf32>,
    return
  }
  func.func @transform_0(%arg0: i32) -> (i32, i32) {
    %c0_i32 = arith.constant 0 : i32
    %c0_i32_0 = arith.constant 0 : i32
    %c0_i32_1 = arith.constant 0 : i32
    return %c0_i32, %c0_i32_0 : i32, i32
  }
  func.func @transform_1(%arg0: i32) -> (i32, i32, i32) {
    %c0_i32 = arith.constant 0 : i32
    %c0_i32_0 = arith.constant 0 : i32
    %c0_i32_1 = arith.constant 0 : i32
    %c0_i32_2 = arith.constant 0 : i32
    return %c0_i32, %c0_i32_0, %c0_i32_1 : i32, i32, i32
  }
  func.func @transform_2(%arg0: i32) -> (i32, i32) {
    %c0_i32 = arith.constant 0 : i32
    %c0_i32_0 = arith.constant 0 : i32
    %c0_i32_1 = arith.constant 0 : i32
    return %c0_i32, %c0_i32_0 : i32, i32
  }
  func.func @transform_3(%arg0: i32) -> (i32, i32) {
    %c0_i32 = arith.constant 0 : i32
    %c0_i32_0 = arith.constant 0 : i32
    %c0_i32_1 = arith.constant 0 : i32
    return %c0_i32, %c0_i32_0 : i32, i32
  }
  func.func @transform_4(%arg0: i32) -> (i32, i32, i32) {
    %c0_i32 = arith.constant 0 : i32
    %c0_i32_0 = arith.constant 0 : i32
    %c0_i32_1 = arith.constant 0 : i32
    %c0_i32_2 = arith.constant 0 : i32
    return %c0_i32, %c0_i32_0, %c0_i32_1 : i32, i32, i32
  }
  func.func @transform_5(%arg0: i32) -> (i32, i32, i32) {
    %c0_i32 = arith.constant 0 : i32
    %c0_i32_0 = arith.constant 0 : i32
    %c0_i32_1 = arith.constant 0 : i32
    %c0_i32_2 = arith.constant 0 : i32
    return %c0_i32, %c0_i32_0, %c0_i32_1 : i32, i32, i32
  }
  func.func @transform_6(%arg0: i32) -> (i32, i32, i32) {
    %c0_i32 = arith.constant 0 : i32
    %c0_i32_0 = arith.constant 0 : i32
    %c0_i32_1 = arith.constant 0 : i32
    %c0_i32_2 = arith.constant 0 : i32
    return %c0_i32, %c0_i32_0, %c0_i32_1 : i32, i32, i32
  }
  func.func @transform_7(%arg0: i32) -> (i32, i32, i32) {
    %c0_i32 = arith.constant 0 : i32
    %c0_i32_0 = arith.constant 0 : i32
    %c0_i32_1 = arith.constant 0 : i32
    %c0_i32_2 = arith.constant 0 : i32
    return %c0_i32, %c0_i32_0, %c0_i32_1 : i32, i32, i32
  }
  func.func @transform_8(%arg0: i32) -> (i32, i32, i32) {
    %c0_i32 = arith.constant 0 : i32
    %c0_i32_0 = arith.constant 0 : i32
    %c0_i32_1 = arith.constant 0 : i32
    %c0_i32_2 = arith.constant 0 : i32
    return %c0_i32, %c0_i32_0, %c0_i32_1 : i32, i32, i32
  }
  func.func @transform_9(%arg0: i32) -> (i32, i32, i32) {
    %c0_i32 = arith.constant 0 : i32
    %c0_i32_0 = arith.constant 0 : i32
    %c0_i32_1 = arith.constant 0 : i32
    %c0_i32_2 = arith.constant 0 : i32
    return %c0_i32, %c0_i32_0, %c0_i32_1 : i32, i32, i32
  }
  func.func @transform_10(%arg0: i32) -> (i32, i32, i32) {
    %c0_i32 = arith.constant 0 : i32
    %c0_i32_0 = arith.constant 0 : i32
    %c0_i32_1 = arith.constant 0 : i32
    %c0_i32_2 = arith.constant 0 : i32
    return %c0_i32, %c0_i32_0, %c0_i32_1 : i32, i32, i32
  }
  func.func @transform_11(%arg0: i32) -> (i32, i32, i32) {
    %c0_i32 = arith.constant 0 : i32
    %c0_i32_0 = arith.constant 0 : i32
    %c0_i32_1 = arith.constant 0 : i32
    %c0_i32_2 = arith.constant 0 : i32
    return %c0_i32, %c0_i32_0, %c0_i32_1 : i32, i32, i32
  }
  func.func @transform_12(%arg0: i32) -> (i32, i32, i32) {
    %c0_i32 = arith.constant 0 : i32
    %c0_i32_0 = arith.constant 0 : i32
    %c0_i32_1 = arith.constant 0 : i32
    %c0_i32_2 = arith.constant 0 : i32
    return %c0_i32, %c0_i32_0, %c0_i32_1 : i32, i32, i32
  }
  func.func @transform_13(%arg0: i32) -> (i32, i32, i32) {
    %c0_i32 = arith.constant 0 : i32
    %c0_i32_0 = arith.constant 0 : i32
    %c0_i32_1 = arith.constant 0 : i32
    %c0_i32_2 = arith.constant 0 : i32
    return %c0_i32, %c0_i32_0, %c0_i32_1 : i32, i32, i32
  }
  func.func @transform_14(%arg0: i32) -> (i32, i32, i32) {
    %c0_i32 = arith.constant 0 : i32
    %c0_i32_0 = arith.constant 0 : i32
    %c0_i32_1 = arith.constant 0 : i32
    %c0_i32_2 = arith.constant 0 : i32
    return %c0_i32, %c0_i32_0, %c0_i32_1 : i32, i32, i32
  }
  func.func @transform_15(%arg0: i32) -> (i32, i32, i32) {
    %c0_i32 = arith.constant 0 : i32
    %c0_i32_0 = arith.constant 0 : i32
    %c0_i32_1 = arith.constant 0 : i32
    %c0_i32_2 = arith.constant 0 : i32
    return %c0_i32, %c0_i32_0, %c0_i32_1 : i32, i32, i32
  }
  func.func @transform_16(%arg0: i32) -> (i32, i32) {
    %c0_i32 = arith.constant 0 : i32
    %c0_i32_0 = arith.constant 0 : i32
    %c0_i32_1 = arith.constant 0 : i32
    return %c0_i32, %c0_i32_0 : i32, i32
  }
  func.func @transform_17(%arg0: i32) -> (i32, i32) {
    %c0_i32 = arith.constant 0 : i32
    %c0_i32_0 = arith.constant 0 : i32
    %c0_i32_1 = arith.constant 0 : i32
    return %c0_i32, %c0_i32_0 : i32, i32
  }
  func.func @transform_18(%arg0: i32) -> (i32, i32) {
    %c0_i32 = arith.constant 0 : i32
    %c0_i32_0 = arith.constant 0 : i32
    %c0_i32_1 = arith.constant 0 : i32
    return %c0_i32, %c0_i32_0 : i32, i32
  }
}

</mosaic_0001>

<bundles_post_ra>
// kernel: tpu_custom_call.1
= control target key start
LH: loop header
LB: loop body
LE: loop exit
PB: predicated region body
PF: predicated region fallthrough
CT: control target
= control target key end

     0   :  { %s5985_s0 = inlined_call_operand.hbm [shape: f32[32,32], index: 0, kind: input, shape index: {}]   ;;  %s5986_s1 = inlined_call_operand.hbm [shape: f32[4,1,8], index: 1, kind: input, shape index: {}]   ;;  %s5987_s2 = inlined_call_operand.hbm [shape: f32[1,32], index: 2, kind: input, shape index: {}]   ;;  %s5988_s3 = inlined_call_operand.hbm [shape: f32[1,32], index: 3, kind: input, shape index: {}]   ;;  %s5989_s4 = inlined_call_operand.vmem [shape: f32[2,32,128], index: 4, kind: input, shape index: {}]   ;;  %s5990_s5 = inlined_call_operand.vmem [shape: f32[2,1,128], index: 5, kind: input, shape index: {}]   ;;  %s5991_s6 = inlined_call_operand.vmem [shape: f32[2,32,32], index: 6, kind: input, shape index: {}]   ;;  %s5992_s7 = inlined_call_operand.vmem [shape: f32[2,1,32], index: 7, kind: input, shape index: {}]   ;;  %s5993_s8 = inlined_call_operand.vmem [shape: f32[2,1,32], index: 8, kind: input, shape index: {}]   ;;  %s5994_s9 = inlined_call_operand.vmem [shape: f32[2,1,32], index: 9, kind: input, shape index: {}]   ;;  %s5995_s10 = inlined_call_operand.vmem [shape: f32[2,32,64], index: 10, kind: input, shape index: {}]   ;;  %s5996_s11 = inlined_call_operand.vmem [shape: f32[2,1,64], index: 11, kind: input, shape index: {}]   ;;  %s5997_s12 = inlined_call_operand.vmem [shape: f32[2,64,32], index: 12, kind: input, shape index: {}]   ;;  %s5998_s13 = inlined_call_operand.vmem [shape: f32[2,1,32], index: 13, kind: input, shape index: {}]   ;;  %s5999_s14 = inlined_call_operand.vmem [shape: f32[2,1,32], index: 14, kind: input, shape index: {}]   ;;  %s6000_s15 = inlined_call_operand.vmem [shape: f32[2,1,32], index: 15, kind: input, shape index: {}]   ;;  %s6001_s16 = inlined_call_operand.hbm [shape: f32[32,96], index: 16, kind: input, shape index: {}]   ;;  %s6002_s17 = inlined_call_operand.vmem [shape: f32[1,96], index: 17, kind: input, shape index: {}]   ;;  %s6003_s18 = inlined_call_operand.hbm [shape: f32[32,128], index: 18, kind: output, shape index: {}]  }
   0x1   :  { %6004 = sst [smem:[#allocation16_spill]] %s5985_s0 }
   0x2   :  { %6005 = sst [smem:[#allocation17_spill]] %s5986_s1 }
   0x3   :  { %6006 = sst [smem:[#allocation18_spill]] %s5987_s2 }
   0x4   :  { %23 = vsyncpa [#allocation3], 0 }
   0x5   :  { %24 = vsyncpa [#allocation6], 0 }
   0x6   :  { %25 = vsyncpa [#allocation9], 0 }
   0x7   :  { %26 = vsyncpa [#allocation4], 0  ;;  %s5173_s27 = smov [#allocation5]  }
   0x8   :  { %s44_s28 = sshll.u32 %s5173_s27, 4  ;;  %s45_s28 = int_to_ptr.vmem [resolvable:$true] %s44_s28 }
   0x9   :  { %s5053_s29 = scalar_lea.vmem %s45_s28, 64  ;;  %p5058_p1 = scmp.lt.s32.totalorder %s45_s28, %s45_s28 }
   0xa   :  { %p5054_p0 = scmp.ne.s32.totalorder %s45_s28, %s5053_s29  ;;  %p5059_p2 = scmp.lt.s32.totalorder %s5053_s29, %s5053_s29 }
   0xc   :  { %p5060_p3 = por %p5059_p2, %p5058_p1 }
   0xe   :  { %p5061_p4 = pnand %p5060_p3, %p5054_p0 }
  0x10   :  { %5064 = shalt.err (!%p5061_p4)
}
  0x11   :  { %s5174_s30 = smov 16   ;;  %s5175_s0 = smov 1  }
  0x12   :  { %s6007_s20 = sld [smem:[#allocation17_spill]]  ;;  %s5176_s21 = smov [#allocation8]  }
  0x13   :  { %s67_s22 = sshll.u32 %s5176_s21, 4  ;;  %s5177_s2 = smov [#allocation2]   ;;  %s68_s22 = int_to_ptr.vmem [resolvable:$true] %s67_s22 }
  0x14   :  { %s32_s23 = sshll.u32 %s5177_s2, 4  ;;  %s5073_s24 = scalar_lea.vmem %s68_s22, 16  ;;  %s33_s23 = int_to_ptr.vmem [resolvable:$true] %s32_s23 }
  0x15   :  { %p5074_p5 = scmp.ne.s32.totalorder %s68_s22, %s5073_s24  ;;  %s5077_s25 = scalar_lea.vmem %s68_s22, 32 }
  0x16   :  { %p5078_p6 = scmp.lt.s32.totalorder %s68_s22, %s68_s22  ;;  %p5079_p7 = scmp.lt.s32.totalorder %s5077_s25, %s5073_s24 }
  0x18   :  { %50 = dma.hbm_to_vmem [thread:$0]  %s6007_s20, 64, %s45_s28, [#allocation6], %s5174_s30, %s5174_s30, %s5175_s0  }
  0x19   :  { %p5080_p8 = por %p5079_p7, %p5078_p6 }
  0x1b   :  { %p5081_p9 = pnand %p5080_p8, %p5074_p5 }
  0x1d   :  { %5084 = shalt.err (!%p5081_p9)
}
  0x1e   :  { %70 = dma.hbm_to_vmem [thread:$0]  %s5988_s3, 16, %s68_s22, [#allocation9]  }
  0x1f   :  { %s5093_s29 = scalar_lea.vmem %s33_s23, 512  ;;  %p5098_p11 = scmp.lt.s32.totalorder %s33_s23, %s33_s23 }
  0x20   :  { %p5094_p10 = scmp.ne.s32.totalorder %s33_s23, %s5093_s29  ;;  %p5099_p12 = scmp.lt.s32.totalorder %s5093_s29, %s5093_s29 }
  0x22   :  { %p5100_p13 = por %p5099_p12, %p5098_p11 }
  0x24   :  { %p5101_p0 = pnand %p5100_p13, %p5094_p10 }
  0x26   :  { %5104 = shalt.err (!%p5101_p0)
}
  0x27   :  { %s5178_s28 = smov 128   ;;  %s5179_s0 = smov 8  }
  0x28   :  { %s6008_s20 = sld [smem:[#allocation16_spill]]  ;;  %s5180_s21 = smov [#allocation7]  }
  0x29   :  { %s57_s2 = sshll.u32 %s5180_s21, 4  ;;  %s5181_s3 = smov [#allocation10]   ;;  %s58_s2 = int_to_ptr.vmem [resolvable:$true] %s57_s2 }
  0x2a   :  { %s100_s22 = sshll.u32 %s5181_s3, 4  ;;  %s5113_s24 = scalar_lea.vmem %s58_s2, 16  ;;  %s101_s22 = int_to_ptr.vmem [resolvable:$true] %s100_s22 }
  0x2b   :  { %p5114_p1 = scmp.ne.s32.totalorder %s58_s2, %s5113_s24  ;;  %s5117_s25 = scalar_lea.vmem %s58_s2, 32 }
  0x2c   :  { %p5118_p2 = scmp.lt.s32.totalorder %s58_s2, %s58_s2  ;;  %p5119_p3 = scmp.lt.s32.totalorder %s5117_s25, %s5113_s24 }
  0x2e   :  { %38 = dma.hbm_to_vmem [thread:$0]  %s6008_s20, 512, %s33_s23, [#allocation3], %s5178_s28, %s5178_s28, %s5179_s0  }
  0x2f   :  { %p5120_p4 = por %p5119_p3, %p5118_p2 }
  0x31   :  { %p5121_p5 = pnand %p5120_p4, %p5114_p1 }
  0x33   :  { %5124 = shalt.err (!%p5121_p5)
}
  0x34   :  { %s6009_s29 = sld [smem:[#allocation18_spill]]  ;;  %s5133_s19 = scalar_lea.vmem %s101_s22, 512 }
  0x35   :  { %p5134_p6 = scmp.ne.s32.totalorder %s101_s22, %s5133_s19  ;;  %p5138_p7 = scmp.lt.s32.totalorder %s101_s22, %s101_s22 }
  0x36   :  { %p5139_p8 = scmp.lt.s32.totalorder %s5133_s19, %s5133_s19 }
  0x38   :  { %p5140_p9 = por %p5139_p8, %p5138_p7 }
  0x3a   :  { %60 = dma.hbm_to_vmem [thread:$0]  %s6009_s29, 16, %s58_s2, [#allocation6]  }
  0x3b   :  { %p5141_p10 = pnand %p5140_p9, %p5134_p6 }
  0x3d   :  { %5144 = shalt.err (!%p5141_p10)
}
  0x3e   :  { %106 = dma.hbm_to_vmem [thread:$0]  %s6001_s16, 512, %s101_s22, [#allocation9], %s5178_s28, %s5178_s28, %s5179_s0  }
  0x3f   :  { %5165 = dma.done.wait [#allocation3], 512  }
  0x40   :  { %5166 = vsyncadd [#allocation3], 4294966784 }
  0x41   :  { %5167 = dma.done.wait [#allocation6], 80  }
  0x42   :  { %5168 = vsyncadd [#allocation6], 4294967216 }
  0x43   :  { %5169 = dma.done.wait [#allocation9], 528  }
  0x44   :  { %5170 = vsyncadd [#allocation9], 4294966768  ;;  %vm130_vm0 = vcmask 261120   ;;  %v124_v0 = vld [vmem:[#allocation2] sm:$0xff]  ;;  %v126_v1 = vld [vmem:[#allocation2 + $0x10] sm:$0xff]  ;;  %v5182_v62 = vmov 0.0  }
  0x45   :  { %v125_v2 = vld [vmem:[#allocation2 + $0x8] sm:$0xff]  ;;  %v131_v3 = vsel %vm130_vm0, %v124_v0, 0.0  ;;  %v137_v4 = vsel %vm130_vm0, %v126_v1, 0.0  ;;  %v127_v5 = vld [vmem:[#allocation2 + $0x18] sm:$0xff]  ;;  %v234_v29 = vld [vmem:[%s5989_s4 + $0x10] sm:$0xff]  ;;  %4616 = vmatprep.subr.mxu1 %v5182_v62  ;;  %vm5183_vm1 = vmmov 0  }
  0x46   :  { %132 = vadd.xlane.f32.xlu0 %v131_v3  ;;  %138 = vadd.xlane.f32.xlu1 %v137_v4  ;;  %v134_v6 = vsel %vm130_vm0, %v125_v2, 0.0  ;;  %v140_v7 = vsel %vm130_vm0, %v127_v5, 0.0  ;;  %v235_v28 = vld [vmem:[%s5989_s4 + $0x18] sm:$0xff]  ;;  %v233_v30 = vld [vmem:[%s5989_s4 + $0x8] sm:$0xff]  ;;  %v232_v31 = vld [vmem:[%s5989_s4] sm:$0xff]  ;;  %s5184_s29 = smov 96  }
  0x47   :  { %4602 = vmatprep.subr.mxu0 %v235_v28  ;;  %v4323_v45 = vld [vmem:[#allocation7] ss:$0 sm:$0xff]  ;;  %v4324_v47 = vld [vmem:[#allocation8] ss:$0 sm:$0xff]  ;;  %4618 = vmatprep.mubr.msk.f32.mxu1 %vm5183_vm1, %v5182_v62  ;;  %v4329_v63 = vld [vmem:[%s5990_s5] ss:$0 sm:$0xff] }
  0x48   :  { %4603 = vmatpush3.msra.mxu0 %v235_v28  ;;  %vm343_vm2 = vcmask 130048   ;;  %vm649_vm3 = vcmask 64512   ;;  %s5185_s19 = smov 64   ;;  %s5186_s23 = smov 80   ;;  %vm2023_vm4 = vcmask 523264   ;;  %vm4295_vm5 = vcmask 785408  }
  0x49   :  { %4604 = vmatprep.subr.mxu0 %v234_v29  ;;  %s5187_s1 = smov 112   ;;  %s5188_s16 = smov 48  }
  0x4a   :  { %135 = vadd.xlane.f32.xlu0 %v134_v6  ;;  %141 = vadd.xlane.f32.xlu1 %v140_v7 }
  0x4b   :  { %4605 = vmatpush3.msra.mxu0 %v234_v29 }
  0x4c   :  { %4606 = vmatprep.subr.mxu0 %v233_v30 }
  0x4d   :  { %4607 = vmatpush3.msra.mxu0 %v233_v30 }
  0x4e   :  { %4608 = vmatprep.subr.mxu0 %v232_v31 }
  0x4f   :  { %4609 = vmatpush3.msra.mxu0 %v232_v31 }
  0x50   :  { %4631 = vmatprep.subr.mxu0 %v5182_v62 }
  0xcf   :  { %v133_v8 = vpop.xlane.xlu0 %132  ;;  %v139_v9 = vpop.xlane.xlu1 %138 }
  0xd0   :  { %v144_v10 = vmul.f32 0.03125, %v133_v8  ;;  %v146_v11 = vmul.f32 0.03125, %v139_v9 }
  0xd2   :  { %v148_v12 = vsub.f32 %v124_v0, %v144_v10  ;;  %v150_v13 = vsub.f32 %v126_v1, %v146_v11 }
  0xd3   :  { %v136_v14 = vpop.xlane.xlu0 %135  ;;  %v142_v15 = vpop.xlane.xlu1 %141 }
  0xd4   :  { %v145_v16 = vmul.f32 0.03125, %v136_v14  ;;  %v147_v17 = vmul.f32 0.03125, %v142_v15  ;;  %v152_v18 = vmul.f32 %v148_v12, %v148_v12  ;;  %v154_v19 = vmul.f32 %v150_v13, %v150_v13 }
  0xd6   :  { %v149_v20 = vsub.f32 %v125_v2, %v145_v16  ;;  %v151_v21 = vsub.f32 %v127_v5, %v147_v17  ;;  %v156_v22 = vsel %vm130_vm0, %v152_v18, 0.0  ;;  %v162_v23 = vsel %vm130_vm0, %v154_v19, 0.0  ;;  %v5396_v16 = vld [vmem:[#allocation5 + $0x1] ss:$0 sm:$0xff] }
  0xd7   :  { %157 = vadd.xlane.f32.xlu0 %v156_v22 }
  0xd8   :  { %v153_v24 = vmul.f32 %v149_v20, %v149_v20  ;;  %v155_v25 = vmul.f32 %v151_v21, %v151_v21 }
  0xda   :  { %v159_v26 = vsel %vm130_vm0, %v153_v24, 0.0  ;;  %v165_v27 = vsel %vm130_vm0, %v155_v25, 0.0 }
  0xdb   :  { %163 = vadd.xlane.f32.xlu0 %v162_v23  ;;  %160 = vadd.xlane.f32.xlu1 %v159_v26  ;;  %v5403_v23 = vld [vmem:[#allocation5 + $0x3] ss:$0 sm:$0xff] }
  0xdf   :  { %166 = vadd.xlane.f32.xlu1 %v165_v27 }
 0x160   :  { %v158_v32 = vpop.xlane.xlu0 %157 }
 0x161   :  { %v168_v33 = vmul.f32 0.03125, %v158_v32 }
 0x163   :  { %v172_v34 = vadd.f32 1e-12, %v168_v33 }
 0x164   :  { %v161_v35 = vpop.xlane.xlu1 %160  ;;  %v164_v36 = vpop.xlane.xlu0 %163 }
 0x165   :  { %4921 = vrsqrt.f32 %v172_v34  ;;  %v169_v37 = vmul.f32 0.03125, %v161_v35  ;;  %v170_v38 = vmul.f32 0.03125, %v164_v36 }
 0x167   :  { %v173_v39 = vadd.f32 1e-12, %v169_v37  ;;  %v174_v40 = vadd.f32 1e-12, %v170_v38 }
 0x168   :  { %v167_v41 = vpop.xlane.xlu1 %166 }
 0x169   :  { %4923 = vrsqrt.f32 %v173_v39  ;;  %v171_v42 = vmul.f32 0.03125, %v167_v41 }
 0x16a   :  { %4925 = vrsqrt.f32 %v174_v40 }
 0x16b   :  { %v175_v43 = vadd.f32 1e-12, %v171_v42 }
 0x16d   :  { %4927 = vrsqrt.f32 %v175_v43 }
 0x172   :  { %v4922_v44 = vpop.eup %4921 }
 0x173   :  { %v180_v46 = vmul.f32 %v4922_v44, %v148_v12  ;;  %v5393_v12 = vld [vmem:[#allocation5] ss:$0 sm:$0xff] }
 0x175   :  { %v190_v48 = vmul.f32 %v4323_v45, %v180_v46 }
 0x176   :  { %v4924_v49 = vpop.eup %4923 }
 0x177   :  { %v4926_v50 = vpop.eup %4925  ;;  %v5328_v51 = vadd.f32 %v4324_v47, %v190_v48  ;;  %v181_v52 = vmul.f32 %v4924_v49, %v149_v20 }
 0x178   :  { %v182_v53 = vmul.f32 %v4926_v50, %v150_v13 }
 0x179   :  { %4610 = vmatprep.mubr.msk.f32.mxu0 %vm130_vm0, %v5328_v51  ;;  %v191_v54 = vmul.f32 %v4323_v45, %v181_v52 }
 0x17a   :  { %v4928_v55 = vpop.eup %4927  ;;  %v192_v56 = vmul.f32 %v4323_v45, %v182_v53 }
 0x17b   :  { %v5332_v57 = vadd.f32 %v4324_v47, %v191_v54  ;;  %v183_v58 = vmul.f32 %v4928_v55, %v151_v21  ;;  %v5400_v21 = vld [vmem:[#allocation5 + $0x2] ss:$0 sm:$0xff] }
 0x17c   :  { %v5334_v59 = vadd.f32 %v4324_v47, %v192_v56 }
 0x17d   :  { %4611 = vmatmul.mubr.msk.f32.vlgmr.msra.gmra.mxu0 %vm130_vm0, %v5332_v57  ;;  %v193_v60 = vmul.f32 %v4323_v45, %v183_v58 }
 0x17e   :  { %4613 = vmatprep.mubr.msk.f32.mxu0 %vm130_vm0, %v5334_v59 }
 0x17f   :  { %v5340_v61 = vadd.f32 %v4324_v47, %v193_v60 }
 0x181   :  { %4614 = vmatmul.mubr.msk.f32.gmra.mxu0 %vm130_vm0, %v5340_v61 }
 0x182   :  { %4633 = vmatprep.mubr.msk.f32.mxu0 %vm5183_vm1, %v5182_v62 }
 0x23d   :  { %v4612_v0 = vpop.f32.mrf.mxu0 }
 0x23e   :  { %v5353_v1 = vadd.f32 %v4612_v0, %v4329_v63 }
 0x23f   :  { %v321_v2 = vpop.f32.mrf.mxu0 }
 0x240   :  { %v5355_v3 = vadd.f32 %v4329_v63, %v321_v2  ;;  %419 = vrot.lane.b32.xlu1 %v5353_v1, %s5184_s29 }
 0x241   :  { %v4615_v4 = vpop.f32.mrf.mxu0 }
 0x242   :  { %341 = vrot.lane.b32.xlu0 %v5355_v3, %s5184_s29  ;;  %v5365_v7 = vadd.f32 %v4615_v4, %v4329_v63 }
 0x243   :  { %v331_v5 = vpop.f32.mrf.mxu0 }
 0x244   :  { %v5361_v6 = vadd.f32 %v4329_v63, %v331_v5 }
 0x246   :  { %496 = vrot.lane.b32.xlu1 %v5361_v6, %s5184_s29 }
 0x24a   :  { %573 = vrot.lane.b32.xlu1 %v5365_v7, %s5184_s29 }
 0x2b2   :  { %v420_v8 = vpop.permute.xlu1 %419 }
 0x2b4   :  { %v342_v9 = vpop.permute.xlu0 %341 }
 0x2b5   :  { %4617 = vmatpush3.xpose.msk.msra.mxu1 %vm343_vm2, %v342_v9 }
 0x2b6   :  { %4621 = vmatprep.subr.mxu1 %v5182_v62 }
 0x2b8   :  { %v497_v10 = vpop.permute.xlu1 %496  ;;  %4619 = vmatmul.mubr.msk.f32.vlgmr.msra.gmra.mxu1 %vm343_vm2, %v5355_v3 }
 0x2b9   :  { %4622 = vmatpush3.xpose.msk.msra.mxu1 %vm343_vm2, %v420_v8  ;;  %4623 = vmatprep.mubr.msk.f32.mxu1 %vm5183_vm1, %v5182_v62 }
 0x2ba   :  { %4626 = vmatprep.subr.mxu1 %v5182_v62 }
 0x2bc   :  { %v574_v11 = vpop.permute.xlu1 %573  ;;  %4624 = vmatmul.mubr.msk.f32.vlgmr.msra.gmra.mxu1 %vm343_vm2, %v5353_v1 }
 0x2bd   :  { %4627 = vmatpush3.xpose.msk.msra.mxu1 %vm343_vm2, %v497_v10  ;;  %4632 = vmatpush3.xpose.msk.msra.mxu0 %vm343_vm2, %v574_v11 }
 0x2be   :  { %4628 = vmatprep.mubr.msk.f32.mxu1 %vm5183_vm1, %v5182_v62  ;;  %4641 = vmatprep.subr.mxu0 %v5182_v62 }
 0x2bf   :  { %4636 = vmatprep.subr.mxu1 %v5182_v62 }
 0x2c0   :  { %4629 = vmatmul.mubr.msk.f32.vlgmr.msra.gmra.mxu1 %vm343_vm2, %v5361_v6  ;;  %4634 = vmatmul.mubr.msk.f32.vlgmr.msra.gmra.mxu0 %vm343_vm2, %v5365_v7 }
 0x2c1   :  { %4638 = vmatprep.mubr.msk.f32.mxu1 %vm5183_vm1, %v5182_v62  ;;  %4643 = vmatprep.mubr.msk.f32.mxu0 %vm5183_vm1, %v5182_v62 }
 0x378   :  { %v414_v13 = vpop.f32.mrf.mxu1 }
 0x379   :  { %v415_v14 = vadd.f32 %v5393_v12, %v414_v13 }
 0x37a   :  { %v4620_v15 = vpop.f32.mrf.mxu1 }
 0x37b   :  { %v650_v17 = vsel %vm649_vm3, %v415_v14, -inf }
 0x37c   :  { %651 = vmax.xlane.f32.xlu0 %v650_v17  ;;  %v491_v18 = vpop.f32.mrf.mxu1 }
 0x37d   :  { %v492_v19 = vadd.f32 %v5396_v16, %v491_v18 }
 0x37e   :  { %v4625_v20 = vpop.f32.mrf.mxu1 }
 0x37f   :  { %v653_v22 = vsel %vm649_vm3, %v492_v19, -inf }
 0x380   :  { %v645_v24 = vpop.f32.mrf.mxu0  ;;  %654 = vmax.xlane.f32.xlu1 %v653_v22  ;;  %v568_v25 = vpop.f32.mrf.mxu1 }
 0x381   :  { %v569_v26 = vadd.f32 %v5400_v21, %v568_v25  ;;  %v646_v29 = vadd.f32 %v5403_v23, %v645_v24 }
 0x382   :  { %v4630_v27 = vpop.f32.mrf.mxu1  ;;  %v4635_v28 = vpop.f32.mrf.mxu0 }
 0x383   :  { %v656_v30 = vsel %vm649_vm3, %v569_v26, -inf  ;;  %v659_v31 = vsel %vm649_vm3, %v646_v29, -inf }
 0x384   :  { %657 = vmax.xlane.f32.xlu0 %v656_v30 }
 0x388   :  { %660 = vmax.xlane.f32.xlu0 %v659_v31 }
 0x391   :  { %770 = vrot.lane.b32.xlu1 %v5353_v1, %s5185_s19 }
 0x395   :  { %846 = vrot.lane.b32.xlu1 %v5361_v6, %s5185_s19 }
 0x399   :  { %922 = vrot.lane.b32.xlu1 %v5365_v7, %s5185_s19 }
 0x39d   :  { %1078 = vrot.lane.b32.xlu1 %v5353_v1, %s5186_s23 }
 0x39e   :  { %694 = vrot.lane.b32.xlu0 %v5355_v3, %s5185_s19 }
 0x3a2   :  { %1000 = vrot.lane.b32.xlu0 %v5355_v3, %s5186_s23 }
 0x405   :  { %v652_v32 = vpop.xlane.xlu0 %651 }
 0x406   :  { %v662_v33 = vsub.f32 %v415_v14, %v652_v32 }
 0x408   :  { %v666_v34 = vmul.f32 1.442695, %v662_v33 }
 0x409   :  { %v655_v35 = vpop.xlane.xlu1 %654 }
 0x40a   :  { %4929 = vpow2.f32 %v666_v34  ;;  %v663_v39 = vsub.f32 %v492_v19, %v655_v35 }
 0x40c   :  { %v668_v43 = vmul.f32 1.442695, %v663_v39 }
 0x40d   :  { %v771_v36 = vpop.permute.xlu1 %770  ;;  %v658_v37 = vpop.xlane.xlu0 %657 }
 0x40e   :  { %v664_v38 = vsub.f32 %v569_v26, %v658_v37  ;;  %4642 = vmatpush3.msra.mxu0 %v771_v36 }
 0x40f   :  { %4651 = vmatprep.subr.mxu0 %v5182_v62 }
 0x410   :  { %v670_v40 = vmul.f32 1.442695, %v664_v38 }
 0x411   :  { %v661_v41 = vpop.xlane.xlu0 %660  ;;  %v847_v55 = vpop.permute.xlu1 %846 }
 0x412   :  { %4931 = vpow2.f32 %v670_v40  ;;  %v665_v42 = vsub.f32 %v646_v29, %v661_v41 }
 0x414   :  { %v672_v44 = vmul.f32 1.442695, %v665_v42 }
 0x415   :  { %v695_v45 = vpop.permute.xlu0 %694  ;;  %v923_v60 = vpop.permute.xlu1 %922 }
 0x416   :  { %4933 = vpow2.f32 %v672_v44  ;;  %4637 = vmatpush3.msra.mxu1 %v695_v45 }
 0x417   :  { %v4930_v46 = vpop.eup %4929  ;;  %4646 = vmatprep.subr.mxu1 %v5182_v62  ;;  %4935 = vpow2.f32 %v668_v43 }
 0x418   :  { %v674_v47 = vsel %vm649_vm3, %v4930_v46, 0.0 }
 0x419   :  { %675 = vadd.xlane.f32.xlu0 %v674_v47  ;;  %v1001_v56 = vpop.permute.xlu0 %1000  ;;  %v1079_v63 = vpop.permute.xlu1 %1078 }
 0x41f   :  { %v4932_v48 = vpop.eup %4931 }
 0x420   :  { %v680_v49 = vsel %vm649_vm3, %v4932_v48, 0.0 }
 0x421   :  { %681 = vadd.xlane.f32.xlu0 %v680_v49 }
 0x423   :  { %v4934_v50 = vpop.eup %4933 }
 0x424   :  { %v683_v52 = vsel %vm649_vm3, %v4934_v50, 0.0  ;;  %v4936_v53 = vpop.eup %4935 }
 0x425   :  { %684 = vadd.xlane.f32.xlu1 %v683_v52  ;;  %v677_v54 = vsel %vm649_vm3, %v4936_v53, 0.0 }
 0x429   :  { %678 = vadd.xlane.f32.xlu1 %v677_v54 }
 0x437   :  { %998 = vrot.lane.b32.xlu0 %v5355_v3, %s5187_s1 }
 0x43a   :  { %1076 = vrot.lane.b32.xlu1 %v5353_v1, %s5187_s1 }
 0x43b   :  { %1156 = vrot.lane.b32.xlu0 %v5361_v6, %s5186_s23 }
 0x43e   :  { %1234 = vrot.lane.b32.xlu1 %v5365_v7, %s5186_s23 }
 0x43f   :  { %1154 = vrot.lane.b32.xlu0 %v5361_v6, %s5187_s1 }
 0x442   :  { %1232 = vrot.lane.b32.xlu1 %v5365_v7, %s5187_s1 }
 0x4a2   :  { %v676_v58 = vpop.xlane.xlu0 %675 }
 0x4a3   :  { %4937 = vrcp.f32 %v676_v58 }
 0x4aa   :  { %v682_v0 = vpop.xlane.xlu0 %681 }
 0x4ab   :  { %4939 = vrcp.f32 %v682_v0 }
 0x4ae   :  { %v685_v2 = vpop.xlane.xlu1 %684  ;;  %v999_v9 = vpop.permute.xlu0 %998 }
 0x4b0   :  { %v4938_v4 = vpop.eup %4937 }
 0x4b1   :  { %v690_v5 = vmul.f32 %v4938_v4, %v4930_v46 }
 0x4b2   :  { %v679_v8 = vpop.xlane.xlu1 %678  ;;  %v1157_v13 = vpop.permute.xlu0 %1156 }
 0x4b3   :  { %4941 = vrcp.f32 %v679_v8  ;;  %4639 = vmatmul.mubr.msk.f32.vlgmr.msra.gmra.mxu1 %vm649_vm3, %v690_v5 }
 0x4b4   :  { %4647 = vmatpush3.msra.mxu1 %v847_v55  ;;  %4648 = vmatprep.mubr.msk.f32.mxu1 %vm5183_vm1, %v5182_v62  ;;  %4943 = vrcp.f32 %v685_v2 }
 0x4b5   :  { %4656 = vmatprep.subr.mxu1 %v5182_v62 }
 0x4b6   :  { %v1077_v18 = vpop.permute.xlu1 %1076  ;;  %v1155_v19 = vpop.permute.xlu0 %1154 }
 0x4b8   :  { %v4940_v10 = vpop.eup %4939 }
 0x4b9   :  { %v692_v11 = vmul.f32 %v4940_v10, %v4932_v48 }
 0x4ba   :  { %v1235_v22 = vpop.permute.xlu1 %1234 }
 0x4bb   :  { %4649 = vmatmul.mubr.msk.f32.vlgmr.msra.gmra.mxu1 %vm649_vm3, %v692_v11 }
 0x4bc   :  { %4657 = vmatpush3.xpose.msk.msra.mxu1 %vm343_vm2, %v1001_v56  ;;  %4658 = vmatprep.mubr.msk.f32.mxu1 %vm5183_vm1, %v5182_v62 }
 0x4bd   :  { %4666 = vmatprep.subr.mxu1 %v5182_v62 }
 0x4be   :  { %v1233_v24 = vpop.permute.xlu1 %1232 }
 0x4bf   :  { %4659 = vmatmul.mubr.msk.f32.vlgmr.msra.gmra.mxu1 %vm343_vm2, %v999_v9 }
 0x4c0   :  { %v4942_v14 = vpop.eup %4941  ;;  %4667 = vmatpush3.xpose.msk.msra.mxu1 %vm343_vm2, %v1157_v13  ;;  %4668 = vmatprep.mubr.msk.f32.mxu1 %vm5183_vm1, %v5182_v62 }
 0x4c1   :  { %v691_v15 = vmul.f32 %v4942_v14, %v4936_v53  ;;  %4676 = vmatprep.subr.mxu1 %v5182_v62  ;;  %v4944_v17 = vpop.eup %4943 }
 0x4c2   :  { %v693_v20 = vmul.f32 %v4944_v17, %v4934_v50 }
 0x4c3   :  { %4644 = vmatmul.mubr.msk.f32.vlgmr.msra.gmra.mxu0 %vm649_vm3, %v691_v15  ;;  %4669 = vmatmul.mubr.msk.f32.vlgmr.msra.gmra.mxu1 %vm343_vm2, %v1155_v19 }
 0x4c4   :  { %4652 = vmatpush3.msra.mxu0 %v923_v60  ;;  %4653 = vmatprep.mubr.msk.f32.mxu0 %vm5183_vm1, %v5182_v62 }
 0x4c5   :  { %4661 = vmatprep.subr.mxu0 %v5182_v62  ;;  %4678 = vmatprep.mubr.msk.f32.mxu1 %vm5183_vm1, %v5182_v62 }
 0x4c7   :  { %4654 = vmatmul.mubr.msk.f32.vlgmr.msra.gmra.mxu0 %vm649_vm3, %v693_v20 }
 0x4c8   :  { %4662 = vmatpush3.xpose.msk.msra.mxu0 %vm343_vm2, %v1079_v63  ;;  %4663 = vmatprep.mubr.msk.f32.mxu0 %vm5183_vm1, %v5182_v62 }
 0x4c9   :  { %4671 = vmatprep.subr.mxu0 %v5182_v62 }
 0x4cb   :  { %4664 = vmatmul.mubr.msk.f32.vlgmr.msra.gmra.mxu0 %vm343_vm2, %v1077_v18 }
 0x4cc   :  { %4672 = vmatpush3.xpose.msk.msra.mxu0 %vm343_vm2, %v1235_v22  ;;  %4673 = vmatprep.mubr.msk.f32.mxu0 %vm5183_vm1, %v5182_v62 }
 0x4cd   :  { %4681 = vmatprep.subr.mxu0 %v5182_v62 }
 0x4cf   :  { %4674 = vmatmul.mubr.msk.f32.vlgmr.msra.gmra.mxu0 %vm343_vm2, %v1233_v24 }
 0x4d0   :  { %4683 = vmatprep.mubr.msk.f32.mxu0 %vm5183_vm1, %v5182_v62 }
 0x573   :  { %v5473_v25 = vpop.f32.mrf.mxu1 }
 0x575   :  { %v4640_v26 = vpop.f32.mrf.mxu1 }
 0x57b   :  { %v5475_v27 = vpop.f32.mrf.mxu1 }
 0x57d   :  { %v4650_v28 = vpop.f32.mrf.mxu1 }
 0x57e   :  { %v1681_v28 = vld [vmem:[%s5991_s6 + $0x18] sm:$0xff] }
 0x57f   :  { %v1072_v29 = vpop.f32.mrf.mxu1 }
 0x580   :  { %v1073_v30 = vadd.f32 %v5393_v12, %v1072_v29  ;;  %v1680_v29 = vld [vmem:[%s5991_s6 + $0x10] sm:$0xff] }
 0x581   :  { %v4660_v31 = vpop.f32.mrf.mxu1 }
 0x582   :  { %v1310_v32 = vsel %vm649_vm3, %v1073_v30, -inf  ;;  %v1678_v31 = vld [vmem:[%s5991_s6] sm:$0xff] }
 0x583   :  { %v5479_v33 = vpop.f32.mrf.mxu0  ;;  %1311 = vmax.xlane.f32.xlu0 %v1310_v32  ;;  %v1228_v34 = vpop.f32.mrf.mxu1 }
 0x584   :  { %v1229_v35 = vadd.f32 %v5400_v21, %v1228_v34 }
 0x585   :  { %v4645_v36 = vpop.f32.mrf.mxu0  ;;  %v4670_v37 = vpop.f32.mrf.mxu1 }
 0x586   :  { %v1316_v38 = vsel %vm649_vm3, %v1229_v35, -inf }
 0x587   :  { %v5483_v39 = vpop.f32.mrf.mxu0  ;;  %1317 = vmax.xlane.f32.xlu0 %v1316_v38 }
 0x589   :  { %v4655_v40 = vpop.f32.mrf.mxu0 }
 0x58b   :  { %v1150_v41 = vpop.f32.mrf.mxu0 }
 0x58c   :  { %v1151_v12 = vadd.f32 %v5396_v16, %v1150_v41 }
 0x58d   :  { %v4665_v42 = vpop.f32.mrf.mxu0 }
 0x58e   :  { %v1313_v43 = vsel %vm649_vm3, %v1151_v12, -inf }
 0x58f   :  { %1314 = vmax.xlane.f32.xlu1 %v1313_v43  ;;  %v1306_v44 = vpop.f32.mrf.mxu0 }
 0x590   :  { %v1307_v45 = vadd.f32 %v5403_v23, %v1306_v44 }
 0x591   :  { %v4675_v46 = vpop.f32.mrf.mxu0 }
 0x592   :  { %v1319_v21 = vsel %vm649_vm3, %v1307_v45, -inf }
 0x593   :  { %1320 = vmax.xlane.f32.xlu0 %v1319_v21 }
 0x60c   :  { %v1312_v47 = vpop.xlane.xlu0 %1311 }
 0x60d   :  { %v1322_v48 = vsub.f32 %v1073_v30, %v1312_v47  ;;  %v1679_v30 = vld [vmem:[%s5991_s6 + $0x8] sm:$0xff] }
 0x60f   :  { %v1326_v49 = vmul.f32 1.442695, %v1322_v48 }
 0x610   :  { %v1318_v50 = vpop.xlane.xlu0 %1317 }
 0x611   :  { %4945 = vpow2.f32 %v1326_v49  ;;  %v1324_v52 = vsub.f32 %v1229_v35, %v1318_v50 }
 0x613   :  { %v1330_v53 = vmul.f32 1.442695, %v1324_v52 }
 0x615   :  { %4947 = vpow2.f32 %v1330_v53 }
 0x618   :  { %v1315_v16 = vpop.xlane.xlu1 %1314 }
 0x619   :  { %v1323_v54 = vsub.f32 %v1151_v12, %v1315_v16 }
 0x61b   :  { %v1328_v55 = vmul.f32 1.442695, %v1323_v54 }
 0x61c   :  { %v1321_v2 = vpop.xlane.xlu0 %1320 }
 0x61d   :  { %4949 = vpow2.f32 %v1328_v55  ;;  %v1325_v4 = vsub.f32 %v1307_v45, %v1321_v2 }
 0x61e   :  { %v4946_v56 = vpop.eup %4945 }
 0x61f   :  { %v1334_v58 = vsel %vm649_vm3, %v4946_v56, 0.0  ;;  %v1332_v5 = vmul.f32 1.442695, %v1325_v4 }
 0x620   :  { %1335 = vadd.xlane.f32.xlu0 %v1334_v58 }
 0x621   :  { %4951 = vpow2.f32 %v1332_v5 }
 0x622   :  { %v4948_v23 = vpop.eup %4947 }
 0x623   :  { %v1340_v60 = vsel %vm649_vm3, %v4948_v23, 0.0 }
 0x624   :  { %1341 = vadd.xlane.f32.xlu0 %v1340_v60 }
 0x62a   :  { %v4950_v63 = vpop.eup %4949 }
 0x62b   :  { %v1337_v0 = vsel %vm649_vm3, %v4950_v63, 0.0 }
 0x62c   :  { %1338 = vadd.xlane.f32.xlu1 %v1337_v0 }
 0x62e   :  { %v4952_v8 = vpop.eup %4951 }
 0x62f   :  { %v1343_v9 = vsel %vm649_vm3, %v4952_v8, 0.0 }
 0x63a   :  { %1354 = vrot.lane.b32.xlu0 %v5355_v3, %s5188_s16 }
 0x63d   :  { %1430 = vrot.lane.b32.xlu1 %v5353_v1, %s5188_s16 }
 0x641   :  { %1506 = vrot.lane.b32.xlu1 %v5361_v6, %s5188_s16 }
 0x665   :  { %1344 = vadd.xlane.f32.xlu1 %v1343_v9 }
 0x676   :  { %1582 = vrot.lane.b32.xlu1 %v5365_v7, %s5188_s16 }
 0x6a9   :  { %v1336_v10 = vpop.xlane.xlu0 %1335 }
 0x6aa   :  { %4953 = vrcp.f32 %v1336_v10 }
 0x6ad   :  { %v1342_v3 = vpop.xlane.xlu0 %1341 }
 0x6ae   :  { %4955 = vrcp.f32 %v1342_v3  ;;  %v1866_v3 = vld [vmem:[%s5995_s10 + $0x10] sm:$0xff] }
 0x6b1   :  { %v1355_v11 = vpop.permute.xlu0 %1354 }
 0x6b2   :  { %4677 = vmatpush3.msra.mxu1 %v1355_v11  ;;  %v1865_v11 = vld [vmem:[%s5995_s10 + $0x8] sm:$0xff] }
 0x6b3   :  { %4686 = vmatprep.subr.mxu1 %v5182_v62 }
 0x6b5   :  { %v1339_v1 = vpop.xlane.xlu1 %1338 }
 0x6b6   :  { %4957 = vrcp.f32 %v1339_v1  ;;  %v1864_v1 = vld [vmem:[%s5995_s10] sm:$0xff] }
 0x6b7   :  { %v4954_v6 = vpop.eup %4953 }
 0x6b8   :  { %v1350_v13 = vmul.f32 %v4954_v6, %v4946_v56 }
 0x6b9   :  { %v1431_v14 = vpop.permute.xlu1 %1430 }
 0x6ba   :  { %4679 = vmatmul.mubr.msk.f32.vlgmr.msra.gmra.mxu1 %vm649_vm3, %v1350_v13  ;;  %4682 = vmatpush3.msra.mxu0 %v1431_v14 }
 0x6bb   :  { %v4956_v15 = vpop.eup %4955  ;;  %4688 = vmatprep.mubr.msk.f32.mxu1 %vm5183_vm1, %v5182_v62  ;;  %4691 = vmatprep.subr.mxu0 %v5182_v62 }
 0x6bc   :  { %v1352_v7 = vmul.f32 %v4956_v15, %v4948_v23 }
 0x6bd   :  { %v1507_v17 = vpop.permute.xlu1 %1506 }
 0x6be   :  { %4687 = vmatpush3.msra.mxu1 %v1507_v17 }
 0x6bf   :  { %4689 = vmatmul.mubr.msk.f32.vlgmr.msra.gmra.mxu1 %vm649_vm3, %v1352_v7  ;;  %4696 = vmatprep.subr.mxu1 %v1681_v28 }
 0x6c0   :  { %4697 = vmatpush3.msra.mxu1 %v1681_v28 }
 0x6c1   :  { %4698 = vmatprep.subr.mxu1 %v1680_v29 }
 0x6c2   :  { %4699 = vmatpush3.msra.mxu1 %v1680_v29 }
 0x6c3   :  { %v4958_v18 = vpop.eup %4957  ;;  %4700 = vmatprep.subr.mxu1 %v1679_v30 }
 0x6c4   :  { %v1351_v19 = vmul.f32 %v4958_v18, %v4950_v63  ;;  %4701 = vmatpush3.msra.mxu1 %v1679_v30 }
 0x6c5   :  { %4702 = vmatprep.subr.mxu1 %v1678_v31 }
 0x6c6   :  { %4684 = vmatmul.mubr.msk.f32.vlgmr.msra.gmra.mxu0 %vm649_vm3, %v1351_v19  ;;  %4703 = vmatpush3.msra.mxu1 %v1678_v31 }
 0x6c7   :  { %4693 = vmatprep.mubr.msk.f32.mxu0 %vm5183_vm1, %v5182_v62 }
 0x6ee   :  { %v1345_v20 = vpop.xlane.xlu1 %1344 }
 0x6ef   :  { %4959 = vrcp.f32 %v1345_v20 }
 0x6f2   :  { %v1583_v22 = vpop.permute.xlu1 %1582 }
 0x6f3   :  { %4692 = vmatpush3.msra.mxu0 %v1583_v22 }
 0x6fc   :  { %v4960_v24 = vpop.eup %4959 }
 0x6fd   :  { %v1353_v26 = vmul.f32 %v4960_v24, %v4952_v8 }
 0x6ff   :  { %4694 = vmatmul.mubr.msk.f32.vlgmr.msra.gmra.mxu0 %vm649_vm3, %v1353_v26 }
 0x77a   :  { %v1426_v32 = vpop.f32.mrf.mxu1 }
 0x77b   :  { %1662 = vrot.lane.b32.xlu0 %v1426_v32, %s5174_s30 }
 0x77c   :  { %v4680_v34 = vpop.f32.mrf.mxu1 }
 0x77f   :  { %v1578_v35 = vpop.f32.mrf.mxu1 }
 0x780   :  { %1666 = vrot.lane.b32.xlu0 %v1578_v35, %s5174_s30  ;;  %v4363_v35 = vld [vmem:[%s5993_s8] ss:$0 sm:$0xff] }
 0x781   :  { %v4690_v36 = vpop.f32.mrf.mxu1 }
 0x786   :  { %v1502_v37 = vpop.f32.mrf.mxu0 }
 0x787   :  { %1664 = vrot.lane.b32.xlu1 %v1502_v37, %s5174_s30 }
 0x788   :  { %v4685_v38 = vpop.f32.mrf.mxu0 }
 0x7bf   :  { %v1654_v40 = vpop.f32.mrf.mxu0 }
 0x7c0   :  { %1668 = vrot.lane.b32.xlu1 %v1654_v40, %s5174_s30  ;;  %v4364_v40 = vld [vmem:[%s5994_s9] ss:$0 sm:$0xff] }
 0x7c1   :  { %v4695_v41 = vpop.f32.mrf.mxu0 }
 0x7ed   :  { %v1663_v12 = vpop.permute.xlu0 %1662 }
 0x7ee   :  { %v1674_v42 = vsel %vm343_vm2, %v5473_v25, %v1663_v12  ;;  %v4358_v25 = vld [vmem:[%s5992_s7] ss:$0 sm:$0xff] }
 0x7ef   :  { %4704 = vmatprep.mubr.msk.f32.mxu1 %vm130_vm0, %v1674_v42 }
 0x7f2   :  { %v1667_v43 = vpop.permute.xlu0 %1666 }
 0x7f3   :  { %v1676_v46 = vsel %vm343_vm2, %v5475_v27, %v1667_v43 }
 0x7f9   :  { %v1665_v44 = vpop.permute.xlu1 %1664 }
 0x7fa   :  { %v1675_v45 = vsel %vm343_vm2, %v5479_v33, %v1665_v44 }
 0x7fb   :  { %4705 = vmatmul.mubr.msk.f32.vlgmr.msra.gmra.mxu1 %vm130_vm0, %v1675_v45 }
 0x7fc   :  { %4707 = vmatprep.mubr.msk.f32.mxu1 %vm130_vm0, %v1676_v46 }
 0x832   :  { %v1669_v21 = vpop.permute.xlu1 %1668 }
 0x833   :  { %v1677_v47 = vsel %vm343_vm2, %v5483_v39, %v1669_v21 }
 0x834   :  { %4708 = vmatmul.mubr.msk.f32.gmra.mxu1 %vm130_vm0, %v1677_v47 }
 0x8bb   :  { %v4706_v48 = vpop.f32.mrf.mxu1 }
 0x8bc   :  { %v1773_v49 = vadd.f32 %v4706_v48, %v4358_v25 }
 0x8bd   :  { %v1767_v33 = vpop.f32.mrf.mxu1 }
 0x8be   :  { %v1768_v50 = vadd.f32 %v4358_v25, %v1767_v33  ;;  %v1787_v27 = vadd.f32 %v1773_v49, %v5332_v57 }
 0x8c0   :  { %v1795_v52 = vsel %vm130_vm0, %v1787_v27, 0.0  ;;  %v1786_v53 = vadd.f32 %v1768_v50, %v5328_v51 }
 0x8c1   :  { %1796 = vadd.xlane.f32.xlu1 %v1795_v52 }
 0x8c2   :  { %v1792_v16 = vsel %vm130_vm0, %v1786_v53, 0.0 }
 0x8c3   :  { %1793 = vadd.xlane.f32.xlu0 %v1792_v16  ;;  %v2015_v16 = vld [vmem:[%s5997_s12 + $0x38] sm:$0xff] }
 0x8c4   :  { %4724 = vmatprep.subr.mxu1 %v2015_v16 }
 0x8c5   :  { %4725 = vmatpush3.msra.mxu1 %v2015_v16 }
 0x8f4   :  { %v4709_v39 = vpop.f32.mrf.mxu1 }
 0x8f5   :  { %v1783_v55 = vadd.f32 %v4709_v39, %v4358_v25  ;;  %v2014_v39 = vld [vmem:[%s5997_s12 + $0x30] sm:$0xff] }
 0x8f6   :  { %v1777_v54 = vpop.f32.mrf.mxu1  ;;  %4726 = vmatprep.subr.mxu1 %v2014_v39 }
 0x8f7   :  { %v1778_v56 = vadd.f32 %v4358_v25, %v1777_v54  ;;  %v1789_v60 = vadd.f32 %v1783_v55, %v5340_v61  ;;  %v1867_v61 = vld [vmem:[%s5995_s10 + $0x18] sm:$0xff]  ;;  %4727 = vmatpush3.msra.mxu1 %v2014_v39  ;;  %v2013_v54 = vld [vmem:[%s5997_s12 + $0x28] sm:$0xff]  ;;  %v2012_v55 = vld [vmem:[%s5997_s12 + $0x20] sm:$0xff] }
 0x8f8   :  { %4710 = vmatprep.subr.mxu0 %v1867_v61  ;;  %4728 = vmatprep.subr.mxu1 %v2013_v54 }
 0x8f9   :  { %v1788_v58 = vadd.f32 %v1778_v56, %v5334_v59  ;;  %v1801_v57 = vsel %vm130_vm0, %v1789_v60, 0.0  ;;  %4711 = vmatpush3.msra.mxu0 %v1867_v61  ;;  %4729 = vmatpush3.msra.mxu1 %v2013_v54  ;;  %v2011_v56 = vld [vmem:[%s5997_s12 + $0x18] sm:$0xff] }
 0x8fa   :  { %4712 = vmatprep.subr.mxu0 %v1866_v3  ;;  %4730 = vmatprep.subr.mxu1 %v2012_v55 }
 0x8fb   :  { %v1798_v23 = vsel %vm130_vm0, %v1788_v58, 0.0  ;;  %4713 = vmatpush3.msra.mxu0 %v1866_v3  ;;  %4731 = vmatpush3.msra.mxu1 %v2012_v55 }
 0x8fc   :  { %1799 = vadd.xlane.f32.xlu0 %v1798_v23  ;;  %4714 = vmatprep.subr.mxu0 %v1865_v11  ;;  %v2009_v23 = vld [vmem:[%s5997_s12 + $0x8] sm:$0xff] }
 0x8fd   :  { %4715 = vmatpush3.msra.mxu0 %v1865_v11  ;;  %4732 = vmatprep.subr.mxu1 %v2011_v56 }
 0x8fe   :  { %4716 = vmatprep.subr.mxu0 %v1864_v1  ;;  %4733 = vmatpush3.msra.mxu1 %v2011_v56 }
 0x8ff   :  { %4717 = vmatpush3.msra.mxu0 %v1864_v1 }
 0x900   :  { %1802 = vadd.xlane.f32.xlu0 %v1801_v57  ;;  %v4365_v57 = vld [vmem:[%s5996_s11] ss:$0 sm:$0xff] }
 0x94a   :  { %v1797_v63 = vpop.xlane.xlu1 %1796 }
 0x94b   :  { %v1805_v51 = vmul.f32 0.03125, %v1797_v63 }
 0x94c   :  { %v1794_v0 = vpop.xlane.xlu0 %1793 }
 0x94d   :  { %v1809_v2 = vsub.f32 %v1787_v27, %v1805_v51  ;;  %v1804_v4 = vmul.f32 0.03125, %v1794_v0 }
 0x94f   :  { %v1808_v5 = vsub.f32 %v1786_v53, %v1804_v4  ;;  %v1813_v8 = vmul.f32 %v1809_v2, %v1809_v2 }
 0x951   :  { %v1819_v9 = vsel %vm130_vm0, %v1813_v8, 0.0  ;;  %v1812_v10 = vmul.f32 %v1808_v5, %v1808_v5 }
 0x952   :  { %1820 = vadd.xlane.f32.xlu1 %v1819_v9 }
 0x953   :  { %v1816_v59 = vsel %vm130_vm0, %v1812_v10, 0.0 }
 0x954   :  { %1817 = vadd.xlane.f32.xlu0 %v1816_v59 }
 0x985   :  { %v1800_v6 = vpop.xlane.xlu0 %1799 }
 0x986   :  { %v1806_v13 = vmul.f32 0.03125, %v1800_v6 }
 0x988   :  { %v1810_v14 = vsub.f32 %v1788_v58, %v1806_v13  ;;  %v2010_v58 = vld [vmem:[%s5997_s12 + $0x10] sm:$0xff] }
 0x989   :  { %v1803_v15 = vpop.xlane.xlu0 %1802  ;;  %4734 = vmatprep.subr.mxu1 %v2010_v58 }
 0x98a   :  { %v1807_v7 = vmul.f32 0.03125, %v1803_v15  ;;  %v1814_v17 = vmul.f32 %v1810_v14, %v1810_v14  ;;  %4735 = vmatpush3.msra.mxu1 %v2010_v58 }
 0x98b   :  { %4736 = vmatprep.subr.mxu1 %v2009_v23 }
 0x98c   :  { %v1811_v18 = vsub.f32 %v1789_v60, %v1807_v7  ;;  %v1822_v19 = vsel %vm130_vm0, %v1814_v17, 0.0  ;;  %v2008_v60 = vld [vmem:[%s5997_s12] sm:$0xff]  ;;  %4737 = vmatpush3.msra.mxu1 %v2009_v23 }
 0x98d   :  { %1823 = vadd.xlane.f32.xlu0 %v1822_v19  ;;  %4738 = vmatprep.subr.mxu1 %v2008_v60 }
 0x98e   :  { %v1815_v20 = vmul.f32 %v1811_v18, %v1811_v18  ;;  %4739 = vmatpush3.msra.mxu1 %v2008_v60 }
 0x98f   :  { %4770 = vmatprep.subr.mxu1 %v5182_v62 }
 0x990   :  { %v1825_v22 = vsel %vm130_vm0, %v1815_v20, 0.0 }
 0x991   :  { %1826 = vadd.xlane.f32.xlu1 %v1825_v22 }
 0x9db   :  { %v1821_v24 = vpop.xlane.xlu1 %1820 }
 0x9dc   :  { %v1829_v26 = vmul.f32 0.03125, %v1821_v24 }
 0x9dd   :  { %v1818_v28 = vpop.xlane.xlu0 %1817 }
 0x9de   :  { %v1833_v29 = vadd.f32 1e-12, %v1829_v26  ;;  %v1828_v30 = vmul.f32 0.03125, %v1818_v28 }
 0x9e0   :  { %4961 = vrsqrt.f32 %v1833_v29  ;;  %v1832_v31 = vadd.f32 1e-12, %v1828_v30 }
 0x9e2   :  { %4963 = vrsqrt.f32 %v1832_v31 }
 0x9ed   :  { %v4962_v32 = vpop.eup %4961 }
 0x9ee   :  { %v1841_v34 = vmul.f32 %v4962_v32, %v1809_v2 }
 0x9ef   :  { %v4964_v36 = vpop.eup %4963 }
 0x9f0   :  { %v1840_v37 = vmul.f32 %v4964_v36, %v1808_v5  ;;  %v1851_v38 = vmul.f32 %v4363_v35, %v1841_v34 }
 0x9f2   :  { %v1850_v41 = vmul.f32 %v4363_v35, %v1840_v37  ;;  %v5574_v42 = vadd.f32 %v4364_v40, %v1851_v38 }
 0x9f4   :  { %v5572_v12 = vadd.f32 %v4364_v40, %v1850_v41 }
 0x9f6   :  { %4718 = vmatprep.mubr.msk.f32.mxu0 %vm130_vm0, %v5572_v12 }
 0x9f7   :  { %4719 = vmatmul.mubr.msk.f32.vlgmr.msra.gmra.mxu0 %vm130_vm0, %v5574_v42 }
 0xa16   :  { %v1824_v43 = vpop.xlane.xlu0 %1823 }
 0xa17   :  { %v1830_v44 = vmul.f32 0.03125, %v1824_v43 }
 0xa19   :  { %v1834_v45 = vadd.f32 1e-12, %v1830_v44 }
 0xa1a   :  { %v1827_v46 = vpop.xlane.xlu1 %1826 }
 0xa1b   :  { %4965 = vrsqrt.f32 %v1834_v45  ;;  %v1831_v21 = vmul.f32 0.03125, %v1827_v46 }
 0xa1d   :  { %v1835_v47 = vadd.f32 1e-12, %v1831_v21 }
 0xa1f   :  { %4967 = vrsqrt.f32 %v1835_v47 }
 0xa28   :  { %v4966_v25 = vpop.eup %4965 }
 0xa29   :  { %v1842_v48 = vmul.f32 %v4966_v25, %v1810_v14  ;;  %v4370_v25 = vld [vmem:[%s5998_s13] ss:$0 sm:$0xff] }
 0xa2b   :  { %v1852_v49 = vmul.f32 %v4363_v35, %v1842_v48 }
 0xa2c   :  { %v4968_v33 = vpop.eup %4967 }
 0xa2d   :  { %v5580_v50 = vadd.f32 %v4364_v40, %v1852_v49  ;;  %v1843_v27 = vmul.f32 %v4968_v33, %v1811_v18 }
 0xa2f   :  { %4721 = vmatprep.mubr.msk.f32.mxu0 %vm130_vm0, %v5580_v50  ;;  %v1853_v52 = vmul.f32 %v4363_v35, %v1843_v27 }
 0xa31   :  { %v5584_v53 = vadd.f32 %v4364_v40, %v1853_v52 }
 0xa33   :  { %4722 = vmatmul.mubr.msk.f32.gmra.mxu0 %vm130_vm0, %v5584_v53 }
 0xab7   :  { %v4720_v63 = vpop.f32.mrf.mxu0 }
 0xab8   :  { %v1959_v51 = vadd.f32 %v4720_v63, %v4365_v57 }
 0xab9   :  { %v1953_v0 = vpop.f32.mrf.mxu0 }
 0xaba   :  { %v1973_v2 = vmul.f32 %v1959_v51, %v1959_v51  ;;  %v1954_v4 = vadd.f32 %v4365_v57, %v1953_v0 }
 0xabc   :  { %v1977_v5 = vmul.f32 %v1973_v2, %v1959_v51  ;;  %v1972_v8 = vmul.f32 %v1954_v4, %v1954_v4 }
 0xabe   :  { %v1981_v9 = vmul.f32 0.044715, %v1977_v5  ;;  %v1976_v10 = vmul.f32 %v1972_v8, %v1954_v4 }
 0xac0   :  { %v1985_v59 = vadd.f32 %v1981_v9, %v1959_v51  ;;  %v1980_v61 = vmul.f32 0.044715, %v1976_v10 }
 0xac2   :  { %v1989_v3 = vmul.f32 0.7978846, %v1985_v59  ;;  %v1984_v11 = vadd.f32 %v1980_v61, %v1954_v4  ;;  %v4379_v59 = vld [vmem:[%s5989_s4 + $0x30] sm:$0xff]  ;;  %v4378_v61 = vld [vmem:[%s5989_s4 + $0x28] sm:$0xff] }
 0xac4   :  { %4969 = vtanh.f32 %v1989_v3  ;;  %v1988_v1 = vmul.f32 0.7978846, %v1984_v11  ;;  %v4377_v3 = vld [vmem:[%s5989_s4 + $0x20] sm:$0xff] }
 0xac6   :  { %4971 = vtanh.f32 %v1988_v1 }
 0xad1   :  { %v4970_v6 = vpop.eup %4969 }
 0xad2   :  { %v1997_v13 = vadd.f32 1.0, %v4970_v6 }
 0xad3   :  { %v4972_v14 = vpop.eup %4971 }
 0xad4   :  { %v1996_v15 = vadd.f32 1.0, %v4972_v14  ;;  %v2001_v7 = vmul.f32 0.5, %v1997_v13 }
 0xad6   :  { %v2000_v17 = vmul.f32 0.5, %v1996_v15  ;;  %v2005_v19 = vmul.f32 %v2001_v7, %v1959_v51 }
 0xad8   :  { %v2004_v18 = vmul.f32 %v2000_v17, %v1954_v4 }
 0xada   :  { %4740 = vmatprep.mubr.msk.f32.mxu1 %vm2023_vm4, %v2004_v18 }
 0xadb   :  { %4741 = vmatmul.mubr.msk.f32.vlgmr.msra.gmra.mxu1 %vm2023_vm4, %v2005_v19 }
 0xaf3   :  { %v4723_v20 = vpop.f32.mrf.mxu0 }
 0xaf4   :  { %v1969_v22 = vadd.f32 %v4723_v20, %v4365_v57 }
 0xaf5   :  { %v1963_v24 = vpop.f32.mrf.mxu0 }
 0xaf6   :  { %v1975_v26 = vmul.f32 %v1969_v22, %v1969_v22  ;;  %v1964_v28 = vadd.f32 %v4365_v57, %v1963_v24 }
 0xaf8   :  { %v1979_v29 = vmul.f32 %v1975_v26, %v1969_v22  ;;  %v1974_v30 = vmul.f32 %v1964_v28, %v1964_v28 }
 0xafa   :  { %v1983_v31 = vmul.f32 0.044715, %v1979_v29  ;;  %v1978_v32 = vmul.f32 %v1974_v30, %v1964_v28 }
 0xafc   :  { %v1987_v34 = vadd.f32 %v1983_v31, %v1969_v22  ;;  %v1982_v35 = vmul.f32 0.044715, %v1978_v32  ;;  %v4375_v32 = vld [vmem:[%s5999_s14] ss:$0 sm:$0xff] }
 0xafe   :  { %v1991_v36 = vmul.f32 0.7978846, %v1987_v34  ;;  %v1986_v37 = vadd.f32 %v1982_v35, %v1964_v28 }
 0xb00   :  { %4973 = vtanh.f32 %v1991_v36  ;;  %v1990_v38 = vmul.f32 0.7978846, %v1986_v37  ;;  %v4376_v37 = vld [vmem:[%s6000_s15] ss:$0 sm:$0xff] }
 0xb02   :  { %4975 = vtanh.f32 %v1990_v38 }
 0xb0d   :  { %v4974_v40 = vpop.eup %4973 }
 0xb0e   :  { %v1999_v41 = vadd.f32 1.0, %v4974_v40 }
 0xb0f   :  { %v4976_v43 = vpop.eup %4975 }
 0xb10   :  { %v1998_v44 = vadd.f32 1.0, %v4976_v43  ;;  %v2003_v45 = vmul.f32 0.5, %v1999_v41 }
 0xb12   :  { %v2002_v46 = vmul.f32 0.5, %v1998_v44  ;;  %v2007_v47 = vmul.f32 %v2003_v45, %v1969_v22 }
 0xb14   :  { %v2006_v21 = vmul.f32 %v2002_v46, %v1964_v28 }
 0xb16   :  { %4743 = vmatprep.mubr.msk.f32.mxu1 %vm2023_vm4, %v2006_v21 }
 0xb17   :  { %4744 = vmatmul.mubr.msk.f32.gmra.mxu1 %vm2023_vm4, %v2007_v47 }
 0xb18   :  { %4772 = vmatprep.mubr.msk.f32.mxu1 %vm5183_vm1, %v5182_v62 }
 0xb9b   :  { %v4742_v48 = vpop.f32.mrf.mxu1 }
 0xb9c   :  { %v2108_v49 = vadd.f32 %v4742_v48, %v4370_v25 }
 0xb9d   :  { %v2102_v33 = vpop.f32.mrf.mxu1 }
 0xb9e   :  { %v2103_v27 = vadd.f32 %v4370_v25, %v2102_v33  ;;  %v2122_v52 = vadd.f32 %v2108_v49, %v5574_v42 }
 0xba0   :  { %v2130_v16 = vsel %vm130_vm0, %v2122_v52, 0.0  ;;  %v2121_v39 = vadd.f32 %v2103_v27, %v5572_v12 }
 0xba1   :  { %2131 = vadd.xlane.f32.xlu1 %v2130_v16 }
 0xba2   :  { %v2127_v54 = vsel %vm130_vm0, %v2121_v39, 0.0 }
 0xba3   :  { %2128 = vadd.xlane.f32.xlu0 %v2127_v54  ;;  %v4382_v54 = vld [vmem:[%s5990_s5 + $0x1] ss:$0 sm:$0xff] }
 0xbd7   :  { %v4745_v55 = vpop.f32.mrf.mxu1 }
 0xbd8   :  { %v2118_v56 = vadd.f32 %v4745_v55, %v4370_v25 }
 0xbd9   :  { %v2112_v58 = vpop.f32.mrf.mxu1 }
 0xbda   :  { %v2113_v23 = vadd.f32 %v4370_v25, %v2112_v58  ;;  %v2124_v60 = vadd.f32 %v2118_v56, %v5584_v53 }
 0xbdc   :  { %v2136_v57 = vsel %vm130_vm0, %v2124_v60, 0.0  ;;  %v2123_v63 = vadd.f32 %v2113_v23, %v5580_v50  ;;  %v4380_v50 = vld [vmem:[%s5989_s4 + $0x38] sm:$0xff] }
 0xbdd   :  { %2137 = vadd.xlane.f32.xlu1 %v2136_v57  ;;  %4746 = vmatprep.subr.mxu0 %v4380_v50 }
 0xbde   :  { %v2133_v42 = vsel %vm130_vm0, %v2123_v63, 0.0  ;;  %4747 = vmatpush3.msra.mxu0 %v4380_v50  ;;  %v5721_v50 = vld [vmem:[#allocation5 + $0x1] ss:$0 sm:$0xff] }
 0xbdf   :  { %2134 = vadd.xlane.f32.xlu0 %v2133_v42  ;;  %4748 = vmatprep.subr.mxu0 %v4379_v59 }
 0xbe0   :  { %4749 = vmatpush3.msra.mxu0 %v4379_v59 }
 0xbe1   :  { %4750 = vmatprep.subr.mxu0 %v4378_v61 }
 0xbe2   :  { %4751 = vmatpush3.msra.mxu0 %v4378_v61 }
 0xbe3   :  { %4752 = vmatprep.subr.mxu0 %v4377_v3 }
 0xbe4   :  { %4753 = vmatpush3.msra.mxu0 %v4377_v3 }
 0xbe5   :  { %4760 = vmatprep.subr.mxu0 %v5182_v62 }
 0xc2a   :  { %v2132_v51 = vpop.xlane.xlu1 %2131 }
 0xc2b   :  { %v2140_v12 = vmul.f32 0.03125, %v2132_v51 }
 0xc2c   :  { %v2129_v0 = vpop.xlane.xlu0 %2128 }
 0xc2d   :  { %v2144_v2 = vsub.f32 %v2122_v52, %v2140_v12  ;;  %v2139_v4 = vmul.f32 0.03125, %v2129_v0 }
 0xc2f   :  { %v2143_v5 = vsub.f32 %v2121_v39, %v2139_v4  ;;  %v2148_v8 = vmul.f32 %v2144_v2, %v2144_v2 }
 0xc31   :  { %v2154_v9 = vsel %vm130_vm0, %v2148_v8, 0.0  ;;  %v2147_v10 = vmul.f32 %v2143_v5, %v2143_v5 }
 0xc32   :  { %2155 = vadd.xlane.f32.xlu1 %v2154_v9 }
 0xc33   :  { %v2151_v53 = vsel %vm130_vm0, %v2147_v10, 0.0 }
 0xc34   :  { %2152 = vadd.xlane.f32.xlu0 %v2151_v53 }
 0xc66   :  { %v2138_v11 = vpop.xlane.xlu1 %2137 }
 0xc67   :  { %v2142_v1 = vmul.f32 0.03125, %v2138_v11 }
 0xc68   :  { %v2135_v6 = vpop.xlane.xlu0 %2134 }
 0xc69   :  { %v2146_v13 = vsub.f32 %v2124_v60, %v2142_v1  ;;  %v2141_v14 = vmul.f32 0.03125, %v2135_v6  ;;  %v5733_v1 = vld [vmem:[#allocation5 + $0x2] ss:$0 sm:$0xff] }
 0xc6b   :  { %v2145_v15 = vsub.f32 %v2123_v63, %v2141_v14  ;;  %v2150_v7 = vmul.f32 %v2146_v13, %v2146_v13 }
 0xc6d   :  { %v2160_v17 = vsel %vm130_vm0, %v2150_v7, 0.0  ;;  %v2149_v18 = vmul.f32 %v2145_v15, %v2145_v15  ;;  %v5737_v7 = vld [vmem:[#allocation5 + $0x3] ss:$0 sm:$0xff] }
 0xc6e   :  { %2161 = vadd.xlane.f32.xlu1 %v2160_v17 }
 0xc6f   :  { %v2157_v19 = vsel %vm130_vm0, %v2149_v18, 0.0 }
 0xc70   :  { %2158 = vadd.xlane.f32.xlu0 %v2157_v19 }
 0xcbb   :  { %v2156_v20 = vpop.xlane.xlu1 %2155 }
 0xcbc   :  { %v2164_v22 = vmul.f32 0.03125, %v2156_v20 }
 0xcbd   :  { %v2153_v24 = vpop.xlane.xlu0 %2152 }
 0xcbe   :  { %v2168_v26 = vadd.f32 1e-12, %v2164_v22  ;;  %v2163_v28 = vmul.f32 0.03125, %v2153_v24 }
 0xcc0   :  { %4977 = vrsqrt.f32 %v2168_v26  ;;  %v2167_v29 = vadd.f32 1e-12, %v2163_v28 }
 0xcc2   :  { %4979 = vrsqrt.f32 %v2167_v29 }
 0xccd   :  { %v4978_v30 = vpop.eup %4977 }
 0xcce   :  { %v2176_v31 = vmul.f32 %v4978_v30, %v2144_v2 }
 0xccf   :  { %v4980_v34 = vpop.eup %4979 }
 0xcd0   :  { %v2175_v35 = vmul.f32 %v4980_v34, %v2143_v5  ;;  %v2186_v36 = vmul.f32 %v4375_v32, %v2176_v31  ;;  %v5717_v5 = vld [vmem:[#allocation5] ss:$0 sm:$0xff] }
 0xcd2   :  { %v2185_v38 = vmul.f32 %v4375_v32, %v2175_v35  ;;  %v5658_v41 = vadd.f32 %v4376_v37, %v2186_v36 }
 0xcd4   :  { %v5656_v40 = vadd.f32 %v4376_v37, %v2185_v38 }
 0xcd6   :  { %4754 = vmatprep.mubr.msk.f32.mxu0 %vm130_vm0, %v5656_v40 }
 0xcd7   :  { %4755 = vmatmul.mubr.msk.f32.vlgmr.msra.gmra.mxu0 %vm130_vm0, %v5658_v41 }
 0xcf7   :  { %v2162_v43 = vpop.xlane.xlu1 %2161 }
 0xcf8   :  { %v2166_v44 = vmul.f32 0.03125, %v2162_v43 }
 0xcf9   :  { %v2159_v45 = vpop.xlane.xlu0 %2158 }
 0xcfa   :  { %v2170_v46 = vadd.f32 1e-12, %v2166_v44  ;;  %v2165_v21 = vmul.f32 0.03125, %v2159_v45 }
 0xcfc   :  { %4981 = vrsqrt.f32 %v2170_v46  ;;  %v2169_v47 = vadd.f32 1e-12, %v2165_v21 }
 0xcfe   :  { %4983 = vrsqrt.f32 %v2169_v47 }
 0xd09   :  { %v4982_v25 = vpop.eup %4981 }
 0xd0a   :  { %v2178_v48 = vmul.f32 %v4982_v25, %v2146_v13 }
 0xd0b   :  { %v4984_v49 = vpop.eup %4983 }
 0xd0c   :  { %v2177_v33 = vmul.f32 %v4984_v49, %v2145_v15  ;;  %v2188_v27 = vmul.f32 %v4375_v32, %v2178_v48 }
 0xd0e   :  { %v2187_v52 = vmul.f32 %v4375_v32, %v2177_v33  ;;  %v5666_v39 = vadd.f32 %v4376_v37, %v2188_v27 }
 0xd10   :  { %v5664_v16 = vadd.f32 %v4376_v37, %v2187_v52 }
 0xd12   :  { %4757 = vmatprep.mubr.msk.f32.mxu0 %vm130_vm0, %v5664_v16 }
 0xd13   :  { %4758 = vmatmul.mubr.msk.f32.gmra.mxu0 %vm130_vm0, %v5666_v39 }
 0xd14   :  { %4762 = vmatprep.mubr.msk.f32.mxu0 %vm5183_vm1, %v5182_v62 }
 0xd97   :  { %v4756_v55 = vpop.f32.mrf.mxu0 }
 0xd98   :  { %v5677_v56 = vadd.f32 %v4756_v55, %v4382_v54 }
 0xd99   :  { %v2290_v58 = vpop.f32.mrf.mxu0 }
 0xd9a   :  { %v5679_v23 = vadd.f32 %v4382_v54, %v2290_v58  ;;  %2387 = vrot.lane.b32.xlu1 %v5677_v56, %s5184_s29 }
 0xd9c   :  { %2310 = vrot.lane.b32.xlu0 %v5679_v23, %s5184_s29 }
 0xdd3   :  { %v4759_v60 = vpop.f32.mrf.mxu0 }
 0xdd4   :  { %v5689_v42 = vadd.f32 %v4759_v60, %v4382_v54 }
 0xdd5   :  { %v2300_v57 = vpop.f32.mrf.mxu0 }
 0xdd6   :  { %v5685_v63 = vadd.f32 %v4382_v54, %v2300_v57 }
 0xdd8   :  { %2464 = vrot.lane.b32.xlu1 %v5685_v63, %s5184_s29 }
 0xddc   :  { %2541 = vrot.lane.b32.xlu1 %v5689_v42, %s5184_s29 }
 0xe0c   :  { %v2388_v12 = vpop.permute.xlu1 %2387 }
 0xe0e   :  { %v2311_v51 = vpop.permute.xlu0 %2310 }
 0xe0f   :  { %4761 = vmatpush3.xpose.msk.msra.mxu0 %vm343_vm2, %v2311_v51 }
 0xe10   :  { %4765 = vmatprep.subr.mxu0 %v5182_v62 }
 0xe12   :  { %4763 = vmatmul.mubr.msk.f32.vlgmr.msra.gmra.mxu0 %vm343_vm2, %v5679_v23 }
 0xe13   :  { %4766 = vmatpush3.xpose.msk.msra.mxu0 %vm343_vm2, %v2388_v12  ;;  %4767 = vmatprep.mubr.msk.f32.mxu0 %vm5183_vm1, %v5182_v62 }
 0xe14   :  { %4775 = vmatprep.subr.mxu0 %v5182_v62 }
 0xe16   :  { %4768 = vmatmul.mubr.msk.f32.vlgmr.msra.gmra.mxu0 %vm343_vm2, %v5677_v56 }
 0xe17   :  { %4777 = vmatprep.mubr.msk.f32.mxu0 %vm5183_vm1, %v5182_v62 }
 0xe4a   :  { %v2465_v0 = vpop.permute.xlu1 %2464 }
 0xe4b   :  { %4771 = vmatpush3.xpose.msk.msra.mxu1 %vm343_vm2, %v2465_v0 }
 0xe4c   :  { %4780 = vmatprep.subr.mxu1 %v5182_v62 }
 0xe4e   :  { %4773 = vmatmul.mubr.msk.f32.vlgmr.msra.gmra.mxu1 %vm343_vm2, %v5685_v63  ;;  %v2542_v2 = vpop.permute.xlu1 %2541 }
 0xe4f   :  { %4776 = vmatpush3.xpose.msk.msra.mxu0 %vm343_vm2, %v2542_v2  ;;  %4782 = vmatprep.mubr.msk.f32.mxu1 %vm5183_vm1, %v5182_v62 }
 0xe50   :  { %4785 = vmatprep.subr.mxu0 %v5182_v62 }
 0xe52   :  { %4778 = vmatmul.mubr.msk.f32.vlgmr.msra.gmra.mxu0 %vm343_vm2, %v5689_v42 }
 0xe53   :  { %4787 = vmatprep.mubr.msk.f32.mxu0 %vm5183_vm1, %v5182_v62 }
 0xed2   :  { %v2382_v4 = vpop.f32.mrf.mxu0 }
 0xed3   :  { %v2383_v8 = vadd.f32 %v5717_v5, %v2382_v4 }
 0xed4   :  { %v4764_v9 = vpop.f32.mrf.mxu0 }
 0xed5   :  { %v2617_v10 = vsel %vm649_vm3, %v2383_v8, -inf }
 0xed6   :  { %2618 = vmax.xlane.f32.xlu0 %v2617_v10  ;;  %v2459_v53 = vpop.f32.mrf.mxu0 }
 0xed7   :  { %v2460_v59 = vadd.f32 %v5721_v50, %v2459_v53 }
 0xed8   :  { %v4769_v61 = vpop.f32.mrf.mxu0 }
 0xed9   :  { %v2620_v3 = vsel %vm649_vm3, %v2460_v59, -inf }
 0xeda   :  { %2621 = vmax.xlane.f32.xlu1 %v2620_v3 }
 0xeeb   :  { %2737 = vrot.lane.b32.xlu1 %v5677_v56, %s5185_s19 }
 0xeef   :  { %2813 = vrot.lane.b32.xlu1 %v5685_v63, %s5185_s19 }
 0xef3   :  { %2889 = vrot.lane.b32.xlu1 %v5689_v42, %s5185_s19 }
 0xef7   :  { %3045 = vrot.lane.b32.xlu1 %v5677_v56, %s5186_s23 }
 0xf0e   :  { %v2536_v11 = vpop.f32.mrf.mxu1 }
 0xf0f   :  { %v2537_v6 = vadd.f32 %v5733_v1, %v2536_v11 }
 0xf10   :  { %v4774_v13 = vpop.f32.mrf.mxu1 }
 0xf11   :  { %v2623_v14 = vsel %vm649_vm3, %v2537_v6, -inf }
 0xf12   :  { %2624 = vmax.xlane.f32.xlu0 %v2623_v14  ;;  %v2613_v15 = vpop.f32.mrf.mxu0 }
 0xf13   :  { %v2614_v17 = vadd.f32 %v5737_v7, %v2613_v15 }
 0xf14   :  { %v4779_v18 = vpop.f32.mrf.mxu0 }
 0xf15   :  { %v2626_v19 = vsel %vm649_vm3, %v2614_v17, -inf }
 0xf16   :  { %2627 = vmax.xlane.f32.xlu0 %v2626_v19 }
 0xf2c   :  { %2661 = vrot.lane.b32.xlu0 %v5679_v23, %s5185_s19 }
 0xf30   :  { %2967 = vrot.lane.b32.xlu0 %v5679_v23, %s5186_s23 }
 0xf5f   :  { %v2619_v20 = vpop.xlane.xlu0 %2618 }
 0xf60   :  { %v2629_v22 = vsub.f32 %v2383_v8, %v2619_v20 }
 0xf62   :  { %v2633_v24 = vmul.f32 1.442695, %v2629_v22 }
 0xf63   :  { %v2622_v26 = vpop.xlane.xlu1 %2621 }
 0xf64   :  { %4985 = vpow2.f32 %v2633_v24  ;;  %v2630_v28 = vsub.f32 %v2460_v59, %v2622_v26 }
 0xf66   :  { %v2635_v29 = vmul.f32 1.442695, %v2630_v28 }
 0xf67   :  { %v2738_v30 = vpop.permute.xlu1 %2737 }
 0xf68   :  { %4987 = vpow2.f32 %v2635_v29  ;;  %4786 = vmatpush3.msra.mxu0 %v2738_v30 }
 0xf69   :  { %4795 = vmatprep.subr.mxu0 %v5182_v62 }
 0xf6b   :  { %v2814_v49 = vpop.permute.xlu1 %2813 }
 0xf6f   :  { %v2890_v33 = vpop.permute.xlu1 %2889 }
 0xf71   :  { %v4986_v31 = vpop.eup %4985 }
 0xf72   :  { %v2641_v32 = vsel %vm649_vm3, %v4986_v31, 0.0 }
 0xf73   :  { %2642 = vadd.xlane.f32.xlu0 %v2641_v32  ;;  %v3046_v52 = vpop.permute.xlu1 %3045 }
 0xf75   :  { %v4988_v34 = vpop.eup %4987 }
 0xf76   :  { %v2644_v35 = vsel %vm649_vm3, %v4988_v34, 0.0 }
 0xf77   :  { %2645 = vadd.xlane.f32.xlu1 %v2644_v35 }
 0xf88   :  { %3043 = vrot.lane.b32.xlu1 %v5677_v56, %s5187_s1 }
 0xf8c   :  { %3201 = vrot.lane.b32.xlu1 %v5689_v42, %s5186_s23 }
 0xf9b   :  { %v2625_v36 = vpop.xlane.xlu0 %2624 }
 0xf9c   :  { %v2631_v37 = vsub.f32 %v2537_v6, %v2625_v36 }
 0xf9e   :  { %v2637_v38 = vmul.f32 1.442695, %v2631_v37 }
 0xf9f   :  { %v2628_v43 = vpop.xlane.xlu0 %2627 }
 0xfa0   :  { %4989 = vpow2.f32 %v2637_v38  ;;  %v2632_v44 = vsub.f32 %v2614_v17, %v2628_v43 }
 0xfa2   :  { %v2639_v45 = vmul.f32 1.442695, %v2632_v44 }
 0xfa3   :  { %v2662_v46 = vpop.permute.xlu0 %2661 }
 0xfa4   :  { %4991 = vpow2.f32 %v2639_v45  ;;  %4781 = vmatpush3.msra.mxu1 %v2662_v46 }
 0xfa5   :  { %4790 = vmatprep.subr.mxu1 %v5182_v62 }
 0xfa7   :  { %v2968_v27 = vpop.permute.xlu0 %2967 }
 0xfad   :  { %v4990_v21 = vpop.eup %4989 }
 0xfae   :  { %v2647_v47 = vsel %vm649_vm3, %v4990_v21, 0.0 }
 0xfaf   :  { %2648 = vadd.xlane.f32.xlu0 %v2647_v47 }
 0xfb1   :  { %v4992_v25 = vpop.eup %4991 }
 0xfb2   :  { %v2650_v48 = vsel %vm649_vm3, %v4992_v25, 0.0 }
 0xfb3   :  { %2651 = vadd.xlane.f32.xlu1 %v2650_v48 }
 0xfc4   :  { %3199 = vrot.lane.b32.xlu1 %v5689_v42, %s5187_s1 }
 0xfc5   :  { %2965 = vrot.lane.b32.xlu0 %v5679_v23, %s5187_s1 }
 0xfc9   :  { %3123 = vrot.lane.b32.xlu0 %v5685_v63, %s5186_s23 }
 0xfcd   :  { %3121 = vrot.lane.b32.xlu0 %v5685_v63, %s5187_s1 }
 0xffc   :  { %v2643_v54 = vpop.xlane.xlu0 %2642 }
 0xffd   :  { %4993 = vrcp.f32 %v2643_v54 }
0x1000   :  { %v2646_v55 = vpop.xlane.xlu1 %2645 }
0x1001   :  { %4995 = vrcp.f32 %v2646_v55 }
0x1004   :  { %v3044_v12 = vpop.permute.xlu1 %3043 }
0x1008   :  { %v3202_v0 = vpop.permute.xlu1 %3201 }
0x100a   :  { %v4994_v58 = vpop.eup %4993 }
0x100b   :  { %v2657_v60 = vmul.f32 %v4994_v58, %v4986_v31 }
0x100d   :  { %4783 = vmatmul.mubr.msk.f32.vlgmr.msra.gmra.mxu1 %vm649_vm3, %v2657_v60 }
0x100e   :  { %v4996_v57 = vpop.eup %4995  ;;  %4791 = vmatpush3.msra.mxu1 %v2814_v49  ;;  %4792 = vmatprep.mubr.msk.f32.mxu1 %vm5183_vm1, %v5182_v62 }
0x100f   :  { %v2658_v51 = vmul.f32 %v4996_v57, %v4988_v34  ;;  %4800 = vmatprep.subr.mxu1 %v5182_v62 }
0x1011   :  { %4788 = vmatmul.mubr.msk.f32.vlgmr.msra.gmra.mxu0 %vm649_vm3, %v2658_v51 }
0x1012   :  { %4796 = vmatpush3.msra.mxu0 %v2890_v33  ;;  %4797 = vmatprep.mubr.msk.f32.mxu0 %vm5183_vm1, %v5182_v62 }
0x1013   :  { %4805 = vmatprep.subr.mxu0 %v5182_v62 }
0x1038   :  { %v2649_v2 = vpop.xlane.xlu0 %2648 }
0x1039   :  { %4997 = vrcp.f32 %v2649_v2 }
0x103c   :  { %v2652_v4 = vpop.xlane.xlu1 %2651  ;;  %v2966_v8 = vpop.permute.xlu0 %2965 }
0x103d   :  { %4999 = vrcp.f32 %v2652_v4 }
0x1040   :  { %v3124_v59 = vpop.permute.xlu0 %3123  ;;  %v3200_v11 = vpop.permute.xlu1 %3199 }
0x1044   :  { %v3122_v3 = vpop.permute.xlu0 %3121 }
0x1046   :  { %v4998_v9 = vpop.eup %4997 }
0x1047   :  { %v2659_v10 = vmul.f32 %v4998_v9, %v4990_v21 }
0x1049   :  { %4793 = vmatmul.mubr.msk.f32.vlgmr.msra.gmra.mxu1 %vm649_vm3, %v2659_v10 }
0x104a   :  { %v5000_v53 = vpop.eup %4999  ;;  %4801 = vmatpush3.xpose.msk.msra.mxu1 %vm343_vm2, %v2968_v27  ;;  %4802 = vmatprep.mubr.msk.f32.mxu1 %vm5183_vm1, %v5182_v62 }
0x104b   :  { %4810 = vmatprep.subr.mxu1 %v5182_v62  ;;  %v2660_v61 = vmul.f32 %v5000_v53, %v4992_v25 }
0x104d   :  { %4798 = vmatmul.mubr.msk.f32.vlgmr.msra.gmra.mxu0 %vm649_vm3, %v2660_v61  ;;  %4803 = vmatmul.mubr.msk.f32.vlgmr.msra.gmra.mxu1 %vm343_vm2, %v2966_v8 }
0x104e   :  { %4806 = vmatpush3.xpose.msk.msra.mxu0 %vm343_vm2, %v3046_v52  ;;  %4811 = vmatpush3.xpose.msk.msra.mxu1 %vm343_vm2, %v3124_v59 }
0x104f   :  { %4807 = vmatprep.mubr.msk.f32.mxu0 %vm5183_vm1, %v5182_v62  ;;  %4812 = vmatprep.mubr.msk.f32.mxu1 %vm5183_vm1, %v5182_v62 }
0x1050   :  { %4815 = vmatprep.subr.mxu0 %v5182_v62  ;;  %4820 = vmatprep.subr.mxu1 %v5182_v62 }
0x1051   :  { %4808 = vmatmul.mubr.msk.f32.vlgmr.msra.gmra.mxu0 %vm343_vm2, %v3044_v12  ;;  %4813 = vmatmul.mubr.msk.f32.vlgmr.msra.gmra.mxu1 %vm343_vm2, %v3122_v3 }
0x1052   :  { %4816 = vmatpush3.xpose.msk.msra.mxu0 %vm343_vm2, %v3202_v0  ;;  %4817 = vmatprep.mubr.msk.f32.mxu0 %vm5183_vm1, %v5182_v62 }
0x1053   :  { %4825 = vmatprep.subr.mxu0 %v5182_v62  ;;  %4822 = vmatprep.mubr.msk.f32.mxu1 %vm5183_vm1, %v5182_v62 }
0x1055   :  { %4818 = vmatmul.mubr.msk.f32.vlgmr.msra.gmra.mxu0 %vm343_vm2, %v3200_v11 }
0x1056   :  { %4827 = vmatprep.mubr.msk.f32.mxu0 %vm5183_vm1, %v5182_v62 }
0x10cd   :  { %v5797_v6 = vpop.f32.mrf.mxu1 }
0x10cf   :  { %v4784_v13 = vpop.f32.mrf.mxu1 }
0x10d1   :  { %v5799_v14 = vpop.f32.mrf.mxu0 }
0x10d3   :  { %v4789_v15 = vpop.f32.mrf.mxu0 }
0x10d4   :  { %v4414_v15 = vld [vmem:[%s5991_s6 + $0x38] sm:$0xff] }
0x1109   :  { %v5801_v17 = vpop.f32.mrf.mxu1 }
0x110b   :  { %v4794_v18 = vpop.f32.mrf.mxu1 }
0x110c   :  { %v4413_v18 = vld [vmem:[%s5991_s6 + $0x30] sm:$0xff] }
0x110d   :  { %v5803_v19 = vpop.f32.mrf.mxu0  ;;  %v3039_v20 = vpop.f32.mrf.mxu1 }
0x110e   :  { %v3040_v22 = vadd.f32 %v5717_v5, %v3039_v20  ;;  %v4411_v20 = vld [vmem:[%s5991_s6 + $0x20] sm:$0xff] }
0x110f   :  { %v4799_v24 = vpop.f32.mrf.mxu0  ;;  %v4804_v26 = vpop.f32.mrf.mxu1 }
0x1110   :  { %v3277_v28 = vsel %vm649_vm3, %v3040_v22, -inf }
0x1111   :  { %3278 = vmax.xlane.f32.xlu0 %v3277_v28  ;;  %v3117_v29 = vpop.f32.mrf.mxu0  ;;  %v3195_v30 = vpop.f32.mrf.mxu1 }
0x1112   :  { %v3118_v31 = vadd.f32 %v5721_v50, %v3117_v29  ;;  %v3196_v32 = vadd.f32 %v5733_v1, %v3195_v30 }
0x1113   :  { %v4809_v34 = vpop.f32.mrf.mxu0  ;;  %v4814_v35 = vpop.f32.mrf.mxu1 }
0x1114   :  { %v3283_v36 = vsel %vm649_vm3, %v3196_v32, -inf  ;;  %v3280_v37 = vsel %vm649_vm3, %v3118_v31, -inf }
0x1115   :  { %3284 = vmax.xlane.f32.xlu0 %v3283_v36  ;;  %3281 = vmax.xlane.f32.xlu1 %v3280_v37  ;;  %v3273_v5 = vpop.f32.mrf.mxu0 }
0x1116   :  { %v3274_v38 = vadd.f32 %v5737_v7, %v3273_v5 }
0x1117   :  { %v4819_v43 = vpop.f32.mrf.mxu0 }
0x1118   :  { %v3286_v44 = vsel %vm649_vm3, %v3274_v38, -inf }
0x1119   :  { %3287 = vmax.xlane.f32.xlu0 %v3286_v44 }
0x119a   :  { %v3279_v45 = vpop.xlane.xlu0 %3278 }
0x119b   :  { %v3289_v46 = vsub.f32 %v3040_v22, %v3279_v45 }
0x119d   :  { %v3293_v50 = vmul.f32 1.442695, %v3289_v46 }
0x119e   :  { %v3285_v21 = vpop.xlane.xlu0 %3284  ;;  %v3282_v1 = vpop.xlane.xlu1 %3281 }
0x119f   :  { %5001 = vpow2.f32 %v3293_v50  ;;  %v3291_v47 = vsub.f32 %v3196_v32, %v3285_v21  ;;  %v3290_v25 = vsub.f32 %v3118_v31, %v3282_v1 }
0x11a1   :  { %v3297_v48 = vmul.f32 1.442695, %v3291_v47  ;;  %v3295_v49 = vmul.f32 1.442695, %v3290_v25 }
0x11a2   :  { %v3288_v58 = vpop.xlane.xlu0 %3287 }
0x11a3   :  { %5003 = vpow2.f32 %v3297_v48  ;;  %v3292_v60 = vsub.f32 %v3274_v38, %v3288_v58 }
0x11a4   :  { %5005 = vpow2.f32 %v3295_v49 }
0x11a5   :  { %v3299_v57 = vmul.f32 1.442695, %v3292_v60 }
0x11a7   :  { %5007 = vpow2.f32 %v3299_v57 }
0x11ac   :  { %v5002_v33 = vpop.eup %5001 }
0x11ad   :  { %v3301_v27 = vsel %vm649_vm3, %v5002_v33, 0.0 }
0x11ae   :  { %3302 = vadd.xlane.f32.xlu0 %v3301_v27 }
0x11b0   :  { %v5004_v7 = vpop.eup %5003 }
0x11b1   :  { %v5006_v52 = vpop.eup %5005  ;;  %v3307_v54 = vsel %vm649_vm3, %v5004_v7, 0.0 }
0x11b2   :  { %v3304_v55 = vsel %vm649_vm3, %v5006_v52, 0.0  ;;  %3308 = vadd.xlane.f32.xlu0 %v3307_v54 }
0x11b3   :  { %3305 = vadd.xlane.f32.xlu1 %v3304_v55 }
0x11b4   :  { %v5008_v51 = vpop.eup %5007 }
0x11b5   :  { %v3310_v12 = vsel %vm649_vm3, %v5008_v51, 0.0 }
0x11c4   :  { %3397 = vrot.lane.b32.xlu1 %v5677_v56, %s5188_s16 }
0x11c8   :  { %3473 = vrot.lane.b32.xlu1 %v5685_v63, %s5188_s16  ;;  %3321 = vrot.lane.b32.xlu0 %v5679_v23, %s5188_s16 }
0x11ec   :  { %3311 = vadd.xlane.f32.xlu1 %v3310_v12 }
0x11fd   :  { %3549 = vrot.lane.b32.xlu1 %v5689_v42, %s5188_s16 }
0x1237   :  { %v3303_v0 = vpop.xlane.xlu0 %3302 }
0x1238   :  { %5009 = vrcp.f32 %v3303_v0  ;;  %v4427_v0 = vld [vmem:[%s5995_s10 + $0x30] sm:$0xff] }
0x123b   :  { %v3309_v56 = vpop.xlane.xlu0 %3308 }
0x123c   :  { %v3306_v2 = vpop.xlane.xlu1 %3305  ;;  %5011 = vrcp.f32 %v3309_v56  ;;  %v4426_v56 = vld [vmem:[%s5995_s10 + $0x28] sm:$0xff] }
0x123d   :  { %5013 = vrcp.f32 %v3306_v2  ;;  %v4425_v2 = vld [vmem:[%s5995_s10 + $0x20] sm:$0xff] }
0x123f   :  { %v3322_v63 = vpop.permute.xlu0 %3321 }
0x1240   :  { %v3398_v4 = vpop.permute.xlu1 %3397  ;;  %4821 = vmatpush3.msra.mxu1 %v3322_v63 }
0x1241   :  { %4826 = vmatpush3.msra.mxu0 %v3398_v4  ;;  %4830 = vmatprep.subr.mxu1 %v5182_v62 }
0x1242   :  { %4835 = vmatprep.subr.mxu0 %v5182_v62 }
0x1244   :  { %v3474_v9 = vpop.permute.xlu1 %3473 }
0x1245   :  { %v5010_v23 = vpop.eup %5009 }
0x1246   :  { %v3317_v8 = vmul.f32 %v5010_v23, %v5002_v33 }
0x1248   :  { %4823 = vmatmul.mubr.msk.f32.vlgmr.msra.gmra.mxu1 %vm649_vm3, %v3317_v8 }
0x1249   :  { %v5012_v42 = vpop.eup %5011  ;;  %4831 = vmatpush3.msra.mxu1 %v3474_v9  ;;  %4832 = vmatprep.mubr.msk.f32.mxu1 %vm5183_vm1, %v5182_v62 }
0x124a   :  { %v5014_v10 = vpop.eup %5013  ;;  %v3319_v53 = vmul.f32 %v5012_v42, %v5004_v7  ;;  %4840 = vmatprep.subr.mxu1 %v4414_v15 }
0x124b   :  { %v3318_v59 = vmul.f32 %v5014_v10, %v5006_v52 }
0x124c   :  { %4833 = vmatmul.mubr.msk.f32.vlgmr.msra.gmra.mxu1 %vm649_vm3, %v3319_v53 }
0x124d   :  { %4828 = vmatmul.mubr.msk.f32.vlgmr.msra.gmra.mxu0 %vm649_vm3, %v3318_v59  ;;  %4841 = vmatpush3.msra.mxu1 %v4414_v15 }
0x124e   :  { %4837 = vmatprep.mubr.msk.f32.mxu0 %vm5183_vm1, %v5182_v62  ;;  %4842 = vmatprep.subr.mxu1 %v4413_v18  ;;  %v4412_v62 = vld [vmem:[%s5991_s6 + $0x28] sm:$0xff] }
0x124f   :  { %4843 = vmatpush3.msra.mxu1 %v4413_v18 }
0x1250   :  { %4844 = vmatprep.subr.mxu1 %v4412_v62 }
0x1251   :  { %4845 = vmatpush3.msra.mxu1 %v4412_v62 }
0x1252   :  { %4846 = vmatprep.subr.mxu1 %v4411_v20 }
0x1253   :  { %4847 = vmatpush3.msra.mxu1 %v4411_v20 }
0x1275   :  { %v3312_v61 = vpop.xlane.xlu1 %3311 }
0x1276   :  { %5015 = vrcp.f32 %v3312_v61 }
0x1279   :  { %v3550_v3 = vpop.permute.xlu1 %3549 }
0x127a   :  { %4836 = vmatpush3.msra.mxu0 %v3550_v3 }
0x1283   :  { %v5016_v11 = vpop.eup %5015 }
0x1284   :  { %v3320_v13 = vmul.f32 %v5016_v11, %v5008_v51 }
0x1286   :  { %4838 = vmatmul.mubr.msk.f32.vlgmr.msra.gmra.mxu0 %vm649_vm3, %v3320_v13 }
0x1308   :  { %v3393_v22 = vpop.f32.mrf.mxu1 }
0x1309   :  { %3629 = vrot.lane.b32.xlu0 %v3393_v22, %s5174_s30 }
0x130a   :  { %v4824_v24 = vpop.f32.mrf.mxu1 }
0x130b   :  { %v4423_v24 = vld [vmem:[%s5993_s8 + $0x1] ss:$0 sm:$0xff] }
0x130c   :  { %v3545_v26 = vpop.f32.mrf.mxu1 }
0x130d   :  { %v3469_v28 = vpop.f32.mrf.mxu0  ;;  %3633 = vrot.lane.b32.xlu0 %v3545_v26, %s5174_s30 }
0x130e   :  { %3631 = vrot.lane.b32.xlu1 %v3469_v28, %s5174_s30  ;;  %v4834_v29 = vpop.f32.mrf.mxu1 }
0x130f   :  { %v4829_v30 = vpop.f32.mrf.mxu0 }
0x1310   :  { %v4424_v30 = vld [vmem:[%s5994_s9 + $0x1] ss:$0 sm:$0xff] }
0x1346   :  { %v3621_v31 = vpop.f32.mrf.mxu0 }
0x1347   :  { %3635 = vrot.lane.b32.xlu1 %v3621_v31, %s5174_s30 }
0x1348   :  { %v4839_v32 = vpop.f32.mrf.mxu0 }
0x137b   :  { %v3630_v34 = vpop.permute.xlu0 %3629 }
0x137c   :  { %v3641_v35 = vsel %vm343_vm2, %v5797_v6, %v3630_v34  ;;  %v4416_v6 = vld [vmem:[%s5992_s7 + $0x1] ss:$0 sm:$0xff] }
0x137d   :  { %4848 = vmatprep.mubr.msk.f32.mxu1 %vm130_vm0, %v3641_v35 }
0x137f   :  { %v3634_v36 = vpop.permute.xlu0 %3633 }
0x1380   :  { %v3643_v37 = vsel %vm343_vm2, %v5801_v17, %v3634_v36  ;;  %v3632_v5 = vpop.permute.xlu1 %3631 }
0x1381   :  { %v3642_v38 = vsel %vm343_vm2, %v5799_v14, %v3632_v5 }
0x1382   :  { %4849 = vmatmul.mubr.msk.f32.vlgmr.msra.gmra.mxu1 %vm130_vm0, %v3642_v38 }
0x1383   :  { %4851 = vmatprep.mubr.msk.f32.mxu1 %vm130_vm0, %v3643_v37 }
0x13b9   :  { %v3636_v43 = vpop.permute.xlu1 %3635 }
0x13ba   :  { %v3644_v44 = vsel %vm343_vm2, %v5803_v19, %v3636_v43 }
0x13bb   :  { %4852 = vmatmul.mubr.msk.f32.gmra.mxu1 %vm130_vm0, %v3644_v44 }
0x1442   :  { %v4850_v45 = vpop.f32.mrf.mxu1 }
0x1443   :  { %v3742_v17 = vadd.f32 %v4850_v45, %v4416_v6 }
0x1444   :  { %v3736_v46 = vpop.f32.mrf.mxu1 }
0x1445   :  { %v3756_v50 = vadd.f32 %v3742_v17, %v5658_v41  ;;  %v3737_v14 = vadd.f32 %v4416_v6, %v3736_v46 }
0x1447   :  { %v3755_v21 = vadd.f32 %v3737_v14, %v5656_v40  ;;  %v3766_v1 = vsel %vm130_vm0, %v3756_v50, 0.0 }
0x1448   :  { %3767 = vadd.xlane.f32.xlu1 %v3766_v1  ;;  %v4442_v1 = vld [vmem:[%s5997_s12 + $0x78] sm:$0xff] }
0x1449   :  { %v3763_v47 = vsel %vm130_vm0, %v3755_v21, 0.0  ;;  %4868 = vmatprep.subr.mxu1 %v4442_v1 }
0x144a   :  { %3764 = vadd.xlane.f32.xlu0 %v3763_v47  ;;  %4869 = vmatpush3.msra.mxu1 %v4442_v1  ;;  %v4441_v47 = vld [vmem:[%s5997_s12 + $0x70] sm:$0xff] }
0x144b   :  { %4870 = vmatprep.subr.mxu1 %v4441_v47 }
0x144c   :  { %4871 = vmatpush3.msra.mxu1 %v4441_v47 }
0x147b   :  { %v4853_v19 = vpop.f32.mrf.mxu1 }
0x147c   :  { %v3752_v48 = vadd.f32 %v4853_v19, %v4416_v6  ;;  %v4440_v19 = vld [vmem:[%s5997_s12 + $0x68] sm:$0xff] }
0x147d   :  { %v3746_v25 = vpop.f32.mrf.mxu1  ;;  %4872 = vmatprep.subr.mxu1 %v4440_v19 }
0x147e   :  { %v3747_v49 = vadd.f32 %v4416_v6, %v3746_v25  ;;  %v3758_v27 = vadd.f32 %v3752_v48, %v5666_v39  ;;  %v4428_v39 = vld [vmem:[%s5995_s10 + $0x38] sm:$0xff]  ;;  %4873 = vmatpush3.msra.mxu1 %v4440_v19  ;;  %v4439_v25 = vld [vmem:[%s5997_s12 + $0x60] sm:$0xff] }
0x147f   :  { %4854 = vmatprep.subr.mxu0 %v4428_v39  ;;  %4874 = vmatprep.subr.mxu1 %v4439_v25  ;;  %v4438_v48 = vld [vmem:[%s5997_s12 + $0x58] sm:$0xff] }
0x1480   :  { %v3757_v33 = vadd.f32 %v3747_v49, %v5664_v16  ;;  %v3772_v41 = vsel %vm130_vm0, %v3758_v27, 0.0  ;;  %4855 = vmatpush3.msra.mxu0 %v4428_v39  ;;  %4875 = vmatpush3.msra.mxu1 %v4439_v25  ;;  %v4437_v49 = vld [vmem:[%s5997_s12 + $0x50] sm:$0xff] }
0x1481   :  { %4856 = vmatprep.subr.mxu0 %v4427_v0  ;;  %4876 = vmatprep.subr.mxu1 %v4438_v48 }
0x1482   :  { %v3769_v7 = vsel %vm130_vm0, %v3757_v33, 0.0  ;;  %4857 = vmatpush3.msra.mxu0 %v4427_v0  ;;  %4877 = vmatpush3.msra.mxu1 %v4438_v48 }
0x1483   :  { %3770 = vadd.xlane.f32.xlu0 %v3769_v7  ;;  %4858 = vmatprep.subr.mxu0 %v4426_v56  ;;  %v4430_v7 = vld [vmem:[%s5996_s11 + $0x1] ss:$0 sm:$0xff] }
0x1484   :  { %4859 = vmatpush3.msra.mxu0 %v4426_v56  ;;  %4878 = vmatprep.subr.mxu1 %v4437_v49 }
0x1485   :  { %4860 = vmatprep.subr.mxu0 %v4425_v2  ;;  %4879 = vmatpush3.msra.mxu1 %v4437_v49 }
0x1486   :  { %4861 = vmatpush3.msra.mxu0 %v4425_v2 }
0x1487   :  { %3773 = vadd.xlane.f32.xlu0 %v3772_v41 }
0x14d1   :  { %v3768_v40 = vpop.xlane.xlu1 %3767 }
0x14d2   :  { %v3776_v52 = vmul.f32 0.03125, %v3768_v40 }
0x14d3   :  { %v3765_v54 = vpop.xlane.xlu0 %3764 }
0x14d4   :  { %v3780_v55 = vsub.f32 %v3756_v50, %v3776_v52  ;;  %v3775_v58 = vmul.f32 0.03125, %v3765_v54 }
0x14d6   :  { %v3779_v60 = vsub.f32 %v3755_v21, %v3775_v58  ;;  %v3784_v57 = vmul.f32 %v3780_v55, %v3780_v55 }
0x14d8   :  { %v3790_v51 = vsel %vm130_vm0, %v3784_v57, 0.0  ;;  %v3783_v12 = vmul.f32 %v3779_v60, %v3779_v60 }
0x14d9   :  { %3791 = vadd.xlane.f32.xlu1 %v3790_v51 }
0x14da   :  { %v3787_v16 = vsel %vm130_vm0, %v3783_v12, 0.0 }
0x14db   :  { %3788 = vadd.xlane.f32.xlu0 %v3787_v16 }
0x150c   :  { %v3771_v63 = vpop.xlane.xlu0 %3770 }
0x150d   :  { %v3777_v4 = vmul.f32 0.03125, %v3771_v63 }
0x150f   :  { %v3781_v23 = vsub.f32 %v3757_v33, %v3777_v4  ;;  %v4436_v33 = vld [vmem:[%s5997_s12 + $0x48] sm:$0xff] }
0x1510   :  { %v3774_v8 = vpop.xlane.xlu0 %3773  ;;  %4880 = vmatprep.subr.mxu1 %v4436_v33 }
0x1511   :  { %v3778_v9 = vmul.f32 0.03125, %v3774_v8  ;;  %v3785_v42 = vmul.f32 %v3781_v23, %v3781_v23  ;;  %4881 = vmatpush3.msra.mxu1 %v4436_v33 }
0x1513   :  { %v3782_v10 = vsub.f32 %v3758_v27, %v3778_v9  ;;  %v3793_v53 = vsel %vm130_vm0, %v3785_v42, 0.0  ;;  %v4435_v27 = vld [vmem:[%s5997_s12 + $0x40] sm:$0xff] }
0x1514   :  { %3794 = vadd.xlane.f32.xlu0 %v3793_v53  ;;  %4882 = vmatprep.subr.mxu1 %v4435_v27 }
0x1515   :  { %v3786_v59 = vmul.f32 %v3782_v10, %v3782_v10  ;;  %4883 = vmatpush3.msra.mxu1 %v4435_v27 }
0x1517   :  { %v3796_v61 = vsel %vm130_vm0, %v3786_v59, 0.0 }
0x1518   :  { %3797 = vadd.xlane.f32.xlu1 %v3796_v61 }
0x1562   :  { %v3792_v3 = vpop.xlane.xlu1 %3791 }
0x1563   :  { %v3800_v11 = vmul.f32 0.03125, %v3792_v3 }
0x1564   :  { %v3789_v13 = vpop.xlane.xlu0 %3788 }
0x1565   :  { %v3804_v15 = vadd.f32 1e-12, %v3800_v11  ;;  %v3799_v18 = vmul.f32 0.03125, %v3789_v13 }
0x1567   :  { %5017 = vrsqrt.f32 %v3804_v15  ;;  %v3803_v62 = vadd.f32 1e-12, %v3799_v18 }
0x1569   :  { %5019 = vrsqrt.f32 %v3803_v62 }
0x1574   :  { %v5018_v20 = vpop.eup %5017 }
0x1575   :  { %v3812_v22 = vmul.f32 %v5018_v20, %v3780_v55 }
0x1576   :  { %v5020_v26 = vpop.eup %5019 }
0x1577   :  { %v3811_v28 = vmul.f32 %v5020_v26, %v3779_v60  ;;  %v3822_v29 = vmul.f32 %v4423_v24, %v3812_v22 }
0x1579   :  { %v3821_v31 = vmul.f32 %v4423_v24, %v3811_v28  ;;  %v5898_v34 = vadd.f32 %v4424_v30, %v3822_v29 }
0x157b   :  { %v5896_v32 = vadd.f32 %v4424_v30, %v3821_v31 }
0x157d   :  { %4862 = vmatprep.mubr.msk.f32.mxu0 %vm130_vm0, %v5896_v32 }
0x157e   :  { %4863 = vmatmul.mubr.msk.f32.vlgmr.msra.gmra.mxu0 %vm130_vm0, %v5898_v34 }
0x159d   :  { %v3795_v35 = vpop.xlane.xlu0 %3794 }
0x159e   :  { %v3801_v36 = vmul.f32 0.03125, %v3795_v35 }
0x15a0   :  { %v3805_v37 = vadd.f32 1e-12, %v3801_v36 }
0x15a1   :  { %v3798_v5 = vpop.xlane.xlu1 %3797 }
0x15a2   :  { %5021 = vrsqrt.f32 %v3805_v37  ;;  %v3802_v38 = vmul.f32 0.03125, %v3798_v5 }
0x15a4   :  { %v3806_v43 = vadd.f32 1e-12, %v3802_v38 }
0x15a6   :  { %5023 = vrsqrt.f32 %v3806_v43  ;;  %v4444_v43 = vld [vmem:[%s5998_s13 + $0x1] ss:$0 sm:$0xff] }
0x15af   :  { %v5022_v44 = vpop.eup %5021 }
0x15b0   :  { %v3813_v6 = vmul.f32 %v5022_v44, %v3781_v23 }
0x15b2   :  { %v3823_v45 = vmul.f32 %v4423_v24, %v3813_v6 }
0x15b3   :  { %v5024_v17 = vpop.eup %5023 }
0x15b4   :  { %v5904_v46 = vadd.f32 %v4424_v30, %v3823_v45  ;;  %v3814_v50 = vmul.f32 %v5024_v17, %v3782_v10 }
0x15b6   :  { %4865 = vmatprep.mubr.msk.f32.mxu0 %vm130_vm0, %v5904_v46  ;;  %v3824_v14 = vmul.f32 %v4423_v24, %v3814_v50 }
0x15b8   :  { %v5908_v21 = vadd.f32 %v4424_v30, %v3824_v14 }
0x15ba   :  { %4866 = vmatmul.mubr.msk.f32.gmra.mxu0 %vm130_vm0, %v5908_v21 }
0x163e   :  { %v4864_v41 = vpop.f32.mrf.mxu0 }
0x163f   :  { %v3932_v40 = vadd.f32 %v4864_v41, %v4430_v7 }
0x1640   :  { %v3926_v52 = vpop.f32.mrf.mxu0 }
0x1641   :  { %v3946_v54 = vmul.f32 %v3932_v40, %v3932_v40  ;;  %v3927_v55 = vadd.f32 %v4430_v7, %v3926_v52 }
0x1643   :  { %v3950_v58 = vmul.f32 %v3946_v54, %v3932_v40  ;;  %v3945_v60 = vmul.f32 %v3927_v55, %v3927_v55 }
0x1645   :  { %v3954_v57 = vmul.f32 0.044715, %v3950_v58  ;;  %v3949_v51 = vmul.f32 %v3945_v60, %v3927_v55 }
0x1647   :  { %v3958_v12 = vadd.f32 %v3954_v57, %v3932_v40  ;;  %v3953_v16 = vmul.f32 0.044715, %v3949_v51  ;;  %v4177_v51 = vld [vmem:[#allocation10 + $0x10] sm:$0xff] }
0x1649   :  { %v3962_v39 = vmul.f32 0.7978846, %v3958_v12  ;;  %v3957_v0 = vadd.f32 %v3953_v16, %v3927_v55  ;;  %v4176_v12 = vld [vmem:[#allocation10 + $0x8] sm:$0xff]  ;;  %v4175_v16 = vld [vmem:[#allocation10] sm:$0xff] }
0x164b   :  { %5025 = vtanh.f32 %v3962_v39  ;;  %v3961_v56 = vmul.f32 0.7978846, %v3957_v0 }
0x164d   :  { %5027 = vtanh.f32 %v3961_v56 }
0x1658   :  { %v5026_v2 = vpop.eup %5025 }
0x1659   :  { %v3970_v63 = vadd.f32 1.0, %v5026_v2 }
0x165a   :  { %v5028_v4 = vpop.eup %5027 }
0x165b   :  { %v3969_v23 = vadd.f32 1.0, %v5028_v4  ;;  %v3974_v8 = vmul.f32 0.5, %v3970_v63 }
0x165d   :  { %v3973_v9 = vmul.f32 0.5, %v3969_v23  ;;  %v3978_v10 = vmul.f32 %v3974_v8, %v3932_v40 }
0x165f   :  { %v3977_v42 = vmul.f32 %v3973_v9, %v3927_v55 }
0x1661   :  { %4884 = vmatprep.mubr.msk.f32.mxu1 %vm2023_vm4, %v3977_v42 }
0x1662   :  { %4885 = vmatmul.mubr.msk.f32.vlgmr.msra.gmra.mxu1 %vm2023_vm4, %v3978_v10 }
0x167a   :  { %v4867_v53 = vpop.f32.mrf.mxu0 }
0x167b   :  { %v3942_v59 = vadd.f32 %v4867_v53, %v4430_v7 }
0x167c   :  { %v3936_v61 = vpop.f32.mrf.mxu0 }
0x167d   :  { %v3948_v3 = vmul.f32 %v3942_v59, %v3942_v59  ;;  %v3937_v11 = vadd.f32 %v4430_v7, %v3936_v61 }
0x167f   :  { %v3952_v13 = vmul.f32 %v3948_v3, %v3942_v59  ;;  %v3947_v15 = vmul.f32 %v3937_v11, %v3937_v11 }
0x1681   :  { %v3956_v18 = vmul.f32 0.044715, %v3952_v13  ;;  %v3951_v62 = vmul.f32 %v3947_v15, %v3937_v11  ;;  %v4451_v15 = vld [vmem:[%s5999_s14 + $0x1] ss:$0 sm:$0xff] }
0x1683   :  { %v3960_v20 = vadd.f32 %v3956_v18, %v3942_v59  ;;  %v3955_v22 = vmul.f32 0.044715, %v3951_v62 }
0x1685   :  { %v3964_v24 = vmul.f32 0.7978846, %v3960_v20  ;;  %v3959_v26 = vadd.f32 %v3955_v22, %v3937_v11  ;;  %v4452_v20 = vld [vmem:[%s6000_s15 + $0x1] ss:$0 sm:$0xff] }
0x1687   :  { %5029 = vtanh.f32 %v3964_v24  ;;  %v3963_v28 = vmul.f32 0.7978846, %v3959_v26 }
0x1689   :  { %5031 = vtanh.f32 %v3963_v28 }
0x1694   :  { %v5030_v29 = vpop.eup %5029 }
0x1695   :  { %v3972_v30 = vadd.f32 1.0, %v5030_v29 }
0x1696   :  { %v5032_v31 = vpop.eup %5031 }
0x1697   :  { %v3971_v35 = vadd.f32 1.0, %v5032_v31  ;;  %v3976_v36 = vmul.f32 0.5, %v3972_v30 }
0x1699   :  { %v3975_v37 = vmul.f32 0.5, %v3971_v35  ;;  %v3980_v38 = vmul.f32 %v3976_v36, %v3942_v59 }
0x169b   :  { %v3979_v5 = vmul.f32 %v3975_v37, %v3937_v11 }
0x169d   :  { %4887 = vmatprep.mubr.msk.f32.mxu1 %vm2023_vm4, %v3979_v5 }
0x169e   :  { %4888 = vmatmul.mubr.msk.f32.gmra.mxu1 %vm2023_vm4, %v3980_v38 }
0x1722   :  { %v4886_v44 = vpop.f32.mrf.mxu1 }
0x1723   :  { %v4082_v6 = vadd.f32 %v4886_v44, %v4444_v43 }
0x1724   :  { %v4076_v45 = vpop.f32.mrf.mxu1 }
0x1725   :  { %v4096_v17 = vadd.f32 %v4082_v6, %v5898_v34  ;;  %v4077_v50 = vadd.f32 %v4444_v43, %v4076_v45 }
0x1727   :  { %v4095_v14 = vadd.f32 %v4077_v50, %v5896_v32  ;;  %v4106_v1 = vsel %vm130_vm0, %v4096_v17, 0.0 }
0x1728   :  { %4107 = vadd.xlane.f32.xlu1 %v4106_v1  ;;  %v4453_v1 = vld [vmem:[%s6002_s17] ss:$0 sm:$0xff] }
0x1729   :  { %v4103_v47 = vsel %vm130_vm0, %v4095_v14, 0.0 }
0x172a   :  { %4104 = vadd.xlane.f32.xlu0 %v4103_v47 }
0x175e   :  { %v4889_v19 = vpop.f32.mrf.mxu1 }
0x175f   :  { %v4092_v25 = vadd.f32 %v4889_v19, %v4444_v43 }
0x1760   :  { %v4086_v48 = vpop.f32.mrf.mxu1 }
0x1761   :  { %v4098_v49 = vadd.f32 %v4092_v25, %v5908_v21  ;;  %v4087_v33 = vadd.f32 %v4444_v43, %v4086_v48 }
0x1763   :  { %v4097_v27 = vadd.f32 %v4087_v33, %v5904_v46  ;;  %v4112_v7 = vsel %vm130_vm0, %v4098_v49, 0.0  ;;  %v4178_v46 = vld [vmem:[#allocation10 + $0x18] sm:$0xff] }
0x1764   :  { %4113 = vadd.xlane.f32.xlu1 %v4112_v7  ;;  %4890 = vmatprep.subr.mxu0 %v4178_v46 }
0x1765   :  { %v4109_v34 = vsel %vm130_vm0, %v4097_v27, 0.0  ;;  %4891 = vmatpush3.msra.mxu0 %v4178_v46 }
0x1766   :  { %4110 = vadd.xlane.f32.xlu0 %v4109_v34  ;;  %4892 = vmatprep.subr.mxu0 %v4177_v51 }
0x1767   :  { %4893 = vmatpush3.msra.mxu0 %v4177_v51 }
0x1768   :  { %4894 = vmatprep.subr.mxu0 %v4176_v12 }
0x1769   :  { %4895 = vmatpush3.msra.mxu0 %v4176_v12 }
0x176a   :  { %4896 = vmatprep.subr.mxu0 %v4175_v16 }
0x176b   :  { %4897 = vmatpush3.msra.mxu0 %v4175_v16 }
0x17b1   :  { %v4108_v32 = vpop.xlane.xlu1 %4107 }
0x17b2   :  { %v4116_v41 = vmul.f32 0.03125, %v4108_v32 }
0x17b3   :  { %v4105_v40 = vpop.xlane.xlu0 %4104 }
0x17b4   :  { %v4120_v52 = vsub.f32 %v4096_v17, %v4116_v41  ;;  %v4115_v54 = vmul.f32 0.03125, %v4105_v40 }
0x17b6   :  { %v4119_v55 = vsub.f32 %v4095_v14, %v4115_v54  ;;  %v4124_v58 = vmul.f32 %v4120_v52, %v4120_v52 }
0x17b8   :  { %v4130_v60 = vsel %vm130_vm0, %v4124_v58, 0.0  ;;  %v4123_v57 = vmul.f32 %v4119_v55, %v4119_v55 }
0x17b9   :  { %4131 = vadd.xlane.f32.xlu1 %v4130_v60 }
0x17ba   :  { %v4127_v21 = vsel %vm130_vm0, %v4123_v57, 0.0 }
0x17bb   :  { %4128 = vadd.xlane.f32.xlu0 %v4127_v21 }
0x17ed   :  { %v4114_v39 = vpop.xlane.xlu1 %4113 }
0x17ee   :  { %v4118_v0 = vmul.f32 0.03125, %v4114_v39 }
0x17ef   :  { %v4111_v56 = vpop.xlane.xlu0 %4110 }
0x17f0   :  { %v4122_v2 = vsub.f32 %v4098_v49, %v4118_v0  ;;  %v4117_v63 = vmul.f32 0.03125, %v4111_v56 }
0x17f2   :  { %v4121_v4 = vsub.f32 %v4097_v27, %v4117_v63  ;;  %v4126_v23 = vmul.f32 %v4122_v2, %v4122_v2 }
0x17f4   :  { %v4136_v8 = vsel %vm130_vm0, %v4126_v23, 0.0  ;;  %v4125_v9 = vmul.f32 %v4121_v4, %v4121_v4 }
0x17f5   :  { %4137 = vadd.xlane.f32.xlu1 %v4136_v8 }
0x17f6   :  { %v4133_v42 = vsel %vm130_vm0, %v4125_v9, 0.0 }
0x17f7   :  { %4134 = vadd.xlane.f32.xlu0 %v4133_v42 }
0x1842   :  { %v4132_v10 = vpop.xlane.xlu1 %4131 }
0x1843   :  { %v4140_v53 = vmul.f32 0.03125, %v4132_v10 }
0x1844   :  { %v4129_v59 = vpop.xlane.xlu0 %4128 }
0x1845   :  { %v4144_v61 = vadd.f32 1e-12, %v4140_v53  ;;  %v4139_v3 = vmul.f32 0.03125, %v4129_v59 }
0x1847   :  { %5033 = vrsqrt.f32 %v4144_v61  ;;  %v4143_v11 = vadd.f32 1e-12, %v4139_v3 }
0x1849   :  { %5035 = vrsqrt.f32 %v4143_v11 }
0x1854   :  { %v5034_v13 = vpop.eup %5033 }
0x1855   :  { %v4152_v18 = vmul.f32 %v5034_v13, %v4120_v52 }
0x1856   :  { %v5036_v62 = vpop.eup %5035 }
0x1857   :  { %v4162_v22 = vmul.f32 %v4451_v15, %v4152_v18  ;;  %v4151_v24 = vmul.f32 %v5036_v62, %v4119_v55 }
0x1859   :  { %v4172_v26 = vadd.f32 %v4452_v20, %v4162_v22  ;;  %v4161_v28 = vmul.f32 %v4451_v15, %v4151_v24 }
0x185b   :  { %4285 = vrot.lane.b32.xlu1 %v4172_v26, %s5184_s29  ;;  %v4171_v29 = vadd.f32 %v4452_v20, %v4161_v28 }
0x185d   :  { %4283 = vrot.lane.b32.xlu0 %v4171_v29, %s5184_s29  ;;  %4898 = vmatprep.mubr.msk.f32.mxu0 %vm130_vm0, %v4171_v29 }
0x185e   :  { %4899 = vmatmul.mubr.msk.f32.vlgmr.msra.gmra.mxu0 %vm130_vm0, %v4172_v26 }
0x187e   :  { %v4138_v30 = vpop.xlane.xlu1 %4137 }
0x187f   :  { %v4142_v31 = vmul.f32 0.03125, %v4138_v30 }
0x1880   :  { %v4135_v35 = vpop.xlane.xlu0 %4134 }
0x1881   :  { %v4146_v36 = vadd.f32 1e-12, %v4142_v31  ;;  %v4141_v37 = vmul.f32 0.03125, %v4135_v35 }
0x1883   :  { %5037 = vrsqrt.f32 %v4146_v36  ;;  %v4145_v5 = vadd.f32 1e-12, %v4141_v37 }
0x1885   :  { %5039 = vrsqrt.f32 %v4145_v5 }
0x1890   :  { %v5038_v38 = vpop.eup %5037 }
0x1891   :  { %v4154_v43 = vmul.f32 %v5038_v38, %v4122_v2 }
0x1892   :  { %v5040_v44 = vpop.eup %5039 }
0x1893   :  { %v4153_v6 = vmul.f32 %v5040_v44, %v4121_v4  ;;  %v4164_v45 = vmul.f32 %v4451_v15, %v4154_v43 }
0x1895   :  { %v4163_v17 = vmul.f32 %v4451_v15, %v4153_v6  ;;  %v4174_v14 = vadd.f32 %v4452_v20, %v4164_v45 }
0x1897   :  { %v4173_v50 = vadd.f32 %v4452_v20, %v4163_v17 }
0x1899   :  { %4287 = vrot.lane.b32.xlu1 %v4173_v50, %s5184_s29  ;;  %4901 = vmatprep.mubr.msk.f32.mxu0 %vm130_vm0, %v4173_v50 }
0x189a   :  { %4902 = vmatmul.mubr.msk.f32.gmra.mxu0 %vm130_vm0, %v4174_v14 }
0x189d   :  { %4289 = vrot.lane.b32.xlu1 %v4174_v14, %s5184_s29  ;;  %s5189_s29 = smov [#allocation11]  }
0x189e   :  { %s4309_s8 = sshll.u32 %s5189_s29, 4  ;;  %s4310_s8 = int_to_ptr.vmem [resolvable:$true] %s4309_s8 }
0x189f   :  { %s5145_s17 = scalar_lea.vmem %s4310_s8, 512  ;;  %p5150_p12 = scmp.lt.s32.totalorder %s4310_s8, %s4310_s8 }
0x18a0   :  { %p5146_p11 = scmp.ne.s32.totalorder %s4310_s8, %s5145_s17  ;;  %p5151_p13 = scmp.lt.s32.totalorder %s5145_s17, %s5145_s17 }
0x18a2   :  { %p5152_p0 = por %p5151_p13, %p5150_p12 }
0x18a4   :  { %p5153_p1 = pnand %p5152_p0, %p5146_p11 }
0x18cd   :  { %v4286_v25 = vpop.permute.xlu1 %4285 }
0x18cf   :  { %v4284_v27 = vpop.permute.xlu0 %4283 }
0x190b   :  { %v4288_v34 = vpop.permute.xlu1 %4287 }
0x190f   :  { %v4290_v40 = vpop.permute.xlu1 %4289 }
0x191e   :  { %v4900_v47 = vpop.f32.mrf.mxu0 }
0x191f   :  { %v4270_v19 = vadd.f32 %v4900_v47, %v4453_v1 }
0x1920   :  { %v4264_v48 = vpop.f32.mrf.mxu0 }
0x1921   :  { %v4297_v49 = vsel %vm4295_vm5, %v4270_v19, %v4286_v25  ;;  %v4265_v33 = vadd.f32 %v4453_v1, %v4264_v48 }
0x1922   :  { %4301 = vst [vmem:[#allocation11 + $0x8] sm:$0xff] %v4297_v49 }
0x1923   :  { %v4296_v7 = vsel %vm4295_vm5, %v4265_v33, %v4284_v27 }
0x1924   :  { %4300 = vst [vmem:[#allocation11] sm:$0xff] %v4296_v7 }
0x195a   :  { %v4903_v32 = vpop.f32.mrf.mxu0 }
0x195b   :  { %v4280_v41 = vadd.f32 %v4903_v32, %v4453_v1 }
0x195c   :  { %v4274_v52 = vpop.f32.mrf.mxu0 }
0x195d   :  { %v4299_v54 = vsel %vm4295_vm5, %v4280_v41, %v4290_v40  ;;  %v4275_v55 = vadd.f32 %v4453_v1, %v4274_v52 }
0x195e   :  { %4303 = vst [vmem:[#allocation11 + $0x18] sm:$0xff] %v4299_v54 }
0x195f   :  { %v4298_v58 = vsel %vm4295_vm5, %v4275_v55, %v4288_v34 }
0x1960   :  { %4302 = vst [vmem:[#allocation11 + $0x10] sm:$0xff] %v4298_v58 }
0x1961   :  { %5156 = shalt.err (!%p5153_p1)
}
0x1962   :  { %4315 = dma.vmem_to_hbm [thread:$0]  %s4310_s8, 512, %s6003_s18, [#allocation4], %s5178_s28, %s5178_s28, %s5179_s0  }
0x1963   :  { %5171 = dma.done.wait [#allocation4], 512  }
0x1964   :  { %5172 = vsyncadd [#allocation4], 4294966784 }
0x1965   :  { %4319 = vsyncpa [#allocation3], 1 }
0x1966   :  { %4320 = vsyncpa [#allocation6], 1 }
0x1967   :  { %4321 = vsyncpa [#allocation9], 1 }
0x1968   :  { %4322 = vsyncpa [#allocation4], 1 }

</bundles_post_ra>
